<compile_context>
chip_gen: v7x
topology: tpu7x:2x2x1
jax: 0.10.0
libtpu: 0.0.40
codegen_flags: <defaults>
</compile_context>

<pallas_src>
import jax
import jax.numpy as jnp
from jax.experimental import pallas as pl
from jax.experimental.pallas import tpu as pltpu

# ---------------------------------------------------------------------------
# Model dimensions (small, consistent with the module's forward)
# ---------------------------------------------------------------------------
B = 2
C, H, W = 4, 16, 16
IMG_DIM = C * H * W          # 1024
GENES_DIM = 32
HIDDEN = 64
LATENT = 16
SMALL_OUT = 2 * LATENT + GENES_DIM   # packed [mu | logvar | x2_recon] = 64 lanes


def _round_up(x, m):
    return ((x + m - 1) // m) * m


# ---------------------------------------------------------------------------
# Fused JMVAE forward kernel (one batch tile per grid step)
# ---------------------------------------------------------------------------
def jmvae_kernel(
    # activations
    x1_ref, x2_ref,
    # encoder layer-1 (per modality)
    ie_w1, ie_b1, ge_w1, ge_b1,
    # fused (mu|logvar) heads (per modality)
    ie_head_w, ie_head_b, ge_head_w, ge_head_b,
    # joint heads as block-diagonal weights (concat-free)
    j1_w, j2_w, j_b,
    # fused decoder layer-1 (image | genes)
    dec_w1, dec_b1,
    # decoder layer-2 (per modality)
    id_w2, id_b2, gd_w2, gd_b2,
    # outputs
    x1r_ref, small_ref,
):
    f32 = jnp.float32
    bf16 = jnp.bfloat16

    def mm(a, w_ref):
        # bf16 x bf16 MXU matmul, f32 accumulation.
        return jnp.dot(a.astype(bf16), w_ref[...], preferred_element_type=f32)

    x1 = x1_ref[...]                                            # bf16 [TM, 1024]
    x2 = x2_ref[...]                                            # f32  [TM, 32]

    # ---- encoders, first layer ----
    h1 = jnp.maximum(mm(x1, ie_w1) + ie_b1[...], 0.0)           # [TM, HIDDEN]
    h2 = jnp.maximum(mm(x2, ge_w1) + ge_b1[...], 0.0)           # [TM, HIDDEN]

    # ---- fused (mu | logvar) heads per modality ----
    hd1 = mm(h1, ie_head_w) + ie_head_b[...]                    # [TM, 2L] = [x1_mu | x1_lv]
    hd2 = mm(h2, ge_head_w) + ge_head_b[...]                    # [TM, 2L] = [x2_mu | x2_lv]

    # ---- joint mu_concat / logvar_concat heads, concat-free ----
    # j1_w = blockdiag(mc_w[:L], lc_w[:L]); j2_w = blockdiag(mc_w[L:], lc_w[L:])
    joint = mm(hd1, j1_w) + mm(hd2, j2_w) + j_b[...]            # [TM, 2L] = [mu | logvar]

    # ---- reparameterize (eval mode: z = mu) ----
    # The logvar rows of dec_w1 are zero, so feeding `joint` is exactly z = mu.
    # TODO(synk): training-mode z = mu + eps*exp(0.5*logvar) would need
    #             pltpu.prng_seed + pltpu.stateful_normal.

    # ---- fused decoder first layers (lane-dense [TM, 128]) ----
    dec_h = jnp.maximum(mm(joint, dec_w1) + dec_b1[...], 0.0)   # [d_img | d_gen]
    d_img = dec_h[:, :HIDDEN]
    d_gen = dec_h[:, HIDDEN:]

    # ---- decoder second layers + sigmoid ----
    # Sigmoid math in f32 (v5e has no bf16 VPU/EUP); store x1_recon as bf16
    # to halve the dominant HBM writeback.
    x1r = jax.nn.sigmoid(mm(d_img, id_w2) + id_b2[...])         # [TM, IMG_DIM] f32
    x1r_ref[...] = x1r.astype(x1r_ref.dtype)

    x2r = jax.nn.sigmoid(mm(d_gen, gd_w2) + gd_b2[...])         # [TM, GENES_DIM] f32
    # Pack the two narrow outputs into one [TM, 64] slab (single output DMA).
    small_ref[...] = jnp.concatenate([joint, x2r], axis=1)


# ---------------------------------------------------------------------------
# Host-side weight fusion / packing
# ---------------------------------------------------------------------------
def fuse_params(p):
    bf16 = jnp.bfloat16
    f32 = jnp.float32
    L = LATENT

    def w(x):
        return x.astype(bf16)

    def bias(x):
        return x.astype(f32)

    def block_diag(a, c):
        za = jnp.zeros((a.shape[0], c.shape[1]), a.dtype)
        zc = jnp.zeros((c.shape[0], a.shape[1]), c.dtype)
        return jnp.concatenate(
            [jnp.concatenate([a, za], axis=1),
             jnp.concatenate([zc, c], axis=1)], axis=0)

    ie_head_w = jnp.concatenate([p["ie_mu_w"], p["ie_lv_w"]], axis=1)   # [H, 2L]
    ie_head_b = jnp.concatenate([p["ie_mu_b"], p["ie_lv_b"]], axis=1)
    ge_head_w = jnp.concatenate([p["ge_mu_w"], p["ge_lv_w"]], axis=1)   # [H, 2L]
    ge_head_b = jnp.concatenate([p["ge_mu_b"], p["ge_lv_b"]], axis=1)

    j1_w = block_diag(p["mc_w"][:L], p["lc_w"][:L])                     # x1 branch [2L, 2L]
    j2_w = block_diag(p["mc_w"][L:], p["lc_w"][L:])                     # x2 branch [2L, 2L]
    j_b = jnp.concatenate([p["mc_b"], p["lc_b"]], axis=1)               # [1, 2L]

    dec_w1_top = jnp.concatenate([p["id_w1"], p["gd_w1"]], axis=1)      # [L, 2H]
    dec_w1 = jnp.concatenate(
        [dec_w1_top, jnp.zeros((L, 2 * HIDDEN), dec_w1_top.dtype)], axis=0)  # [2L, 2H]
    dec_b1 = jnp.concatenate([p["id_b1"], p["gd_b1"]], axis=1)          # [1, 2H]

    return [
        w(p["ie_w1"]), bias(p["ie_b1"]), w(p["ge_w1"]), bias(p["ge_b1"]),
        w(ie_head_w), bias(ie_head_b), w(ge_head_w), bias(ge_head_b),
        w(j1_w), w(j2_w), bias(j_b),
        w(dec_w1), bias(dec_b1),
        w(p["id_w2"]), bias(p["id_b2"]), w(p["gd_w2"]), bias(p["gd_b2"]),
    ]


# ---------------------------------------------------------------------------
# Tile / grid selection and pallas_call construction
# ---------------------------------------------------------------------------
def _pick_batch_tile(b, block_b):
    b8 = _round_up(max(b, 1), 8)
    if b8 <= 8:
        return 8
    # Keep >= 2 grid steps so the ("parallel",) batch axis can shard across
    # v7x's two TensorCores; cap at 1024 so f32/bf16 double-buffers stay well
    # inside the default scoped VMEM on every chip (incl. v5e's 16 MiB).
    half = _round_up((b8 + 1) // 2, 8)
    return max(8, min(block_b, half, 1024))


def _build_call(tm, padded_b, fused, single_buffer_weights):
    def act_spec(n):
        return pl.BlockSpec((tm, n), lambda i: (i, 0))

    def resident_spec(arr):
        nd = arr.ndim
        if single_buffer_weights:
            # Weight block index never changes -> no need for double buffering.
            return pl.BlockSpec(arr.shape, lambda i: (0,) * nd,
                                pipeline_mode=pl.Buffered(1))
        return pl.BlockSpec(arr.shape, lambda i: (0,) * nd)

    in_specs = ([act_spec(IMG_DIM), act_spec(GENES_DIM)]
                + [resident_spec(a) for a in fused])
    out_specs = [act_spec(IMG_DIM), act_spec(SMALL_OUT)]
    out_shapes = (
        jax.ShapeDtypeStruct((padded_b, IMG_DIM), jnp.bfloat16),    # x1_recon (flat)
        jax.ShapeDtypeStruct((padded_b, SMALL_OUT), jnp.float32),   # [mu | logvar | x2_recon]
    )
    return pl.pallas_call(
        jmvae_kernel,
        out_shape=out_shapes,
        grid=(padded_b // tm,),
        in_specs=in_specs,
        out_specs=out_specs,
        compiler_params=pltpu.CompilerParams(
            dimension_semantics=("parallel",)),
    )


# ---------------------------------------------------------------------------
# Wrapper
# ---------------------------------------------------------------------------
def jmvae_forward(x1_nchw, x2, params, *, block_b=512):
    """Fused JMVAE forward. x1_nchw: [B,C,H,W], x2: [B,GENES_DIM]."""
    b = x1_nchw.shape[0]
    # bf16 activation stream: the kernel already ran bf16 x bf16 matmuls, so
    # handing it bf16 x1 halves the dominant HBM read with identical numerics.
    x1_flat = x1_nchw.reshape(b, -1).astype(jnp.bfloat16)   # row-major == torch .view
    x2_in = x2.astype(jnp.float32)

    tm = _pick_batch_tile(b, block_b)
    padded_b = _round_up(b, tm)
    pad = padded_b - b
    if pad:
        x1_flat = jnp.pad(x1_flat, ((0, pad), (0, 0)))
        x2_in = jnp.pad(x2_in, ((0, pad), (0, 0)))

    fused = fuse_params(params)

    try:
        call = _build_call(tm, padded_b, fused, single_buffer_weights=True)
        x1r_flat, small = call(x1_flat, x2_in, *fused)
    except Exception:
        # Fallback if this Pallas build rejects pipeline_mode=pl.Buffered(1).
        call = _build_call(tm, padded_b, fused, single_buffer_weights=False)
        x1r_flat, small = call(x1_flat, x2_in, *fused)

    x1_recon = x1r_flat[:b].reshape(x1_nchw.shape)          # bf16
    mu = small[:b, :LATENT]
    logvar = small[:b, LATENT:2 * LATENT]
    x2_recon = small[:b, 2 * LATENT:]
    return x1_recon, x2_recon, mu, logvar


# ---------------------------------------------------------------------------
# Pure-JAX reference (unfused, f32) — mirrors the torch forward exactly
# ---------------------------------------------------------------------------
def jmvae_reference(x1_nchw, x2, p):
    b = x1_nchw.shape[0]
    x1 = x1_nchw.reshape(b, -1)
    relu = lambda v: jnp.maximum(v, 0.0)

    h1 = relu(x1 @ p["ie_w1"] + p["ie_b1"])
    x1_mu = h1 @ p["ie_mu_w"] + p["ie_mu_b"]
    x1_lv = h1 @ p["ie_lv_w"] + p["ie_lv_b"]

    h2 = relu(x2 @ p["ge_w1"] + p["ge_b1"])
    x2_mu = h2 @ p["ge_mu_w"] + p["ge_mu_b"]
    x2_lv = h2 @ p["ge_lv_w"] + p["ge_lv_b"]

    mu = jnp.concatenate([x1_mu, x2_mu], axis=1) @ p["mc_w"] + p["mc_b"]
    logvar = jnp.concatenate([x1_lv, x2_lv], axis=1) @ p["lc_w"] + p["lc_b"]
    z = mu  # eval mode

    x1_recon = jax.nn.sigmoid(relu(z @ p["id_w1"] + p["id_b1"]) @ p["id_w2"] + p["id_b2"])
    x2_recon = jax.nn.sigmoid(relu(z @ p["gd_w1"] + p["gd_b1"]) @ p["gd_w2"] + p["gd_b2"])
    return x1_recon.reshape(x1_nchw.shape), x2_recon, mu, logvar


# ---------------------------------------------------------------------------
# Deterministic parameter initialization (torch nn.Linear-style)
# ---------------------------------------------------------------------------
def init_params(key):
    def lin(k, fan_in, fan_out):
        kw, kb = jax.random.split(k)
        scale = 1.0 / jnp.sqrt(jnp.float32(fan_in))
        w = jax.random.uniform(kw, (fan_in, fan_out), jnp.float32, -scale, scale)
        b = jax.random.uniform(kb, (1, fan_out), jnp.float32, -scale, scale)
        return w, b

    keys = jax.random.split(key, 12)
    p = {}
    # image encoder: IMG_DIM -> HIDDEN -> (LATENT, LATENT)
    p["ie_w1"], p["ie_b1"] = lin(keys[0], IMG_DIM, HIDDEN)
    p["ie_mu_w"], p["ie_mu_b"] = lin(keys[1], HIDDEN, LATENT)
    p["ie_lv_w"], p["ie_lv_b"] = lin(keys[2], HIDDEN, LATENT)
    # genes encoder: GENES_DIM -> HIDDEN -> (LATENT, LATENT)
    p["ge_w1"], p["ge_b1"] = lin(keys[3], GENES_DIM, HIDDEN)
    p["ge_mu_w"], p["ge_mu_b"] = lin(keys[4], HIDDEN, LATENT)
    p["ge_lv_w"], p["ge_lv_b"] = lin(keys[5], HIDDEN, LATENT)
    # joint concat heads: 2*LATENT -> LATENT
    p["mc_w"], p["mc_b"] = lin(keys[6], 2 * LATENT, LATENT)
    p["lc_w"], p["lc_b"] = lin(keys[7], 2 * LATENT, LATENT)
    # image decoder: LATENT -> HIDDEN -> IMG_DIM
    p["id_w1"], p["id_b1"] = lin(keys[8], LATENT, HIDDEN)
    p["id_w2"], p["id_b2"] = lin(keys[9], HIDDEN, IMG_DIM)
    # genes decoder: LATENT -> HIDDEN -> GENES_DIM
    p["gd_w1"], p["gd_b1"] = lin(keys[10], LATENT, HIDDEN)
    p["gd_w2"], p["gd_b2"] = lin(keys[11], HIDDEN, GENES_DIM)
    return p


if __name__ == "__main__":
    key = jax.random.PRNGKey(0)
    k_x1, k_x2, k_params = jax.random.split(key, 3)

    x1 = jax.random.normal(k_x1, (B, C, H, W), jnp.float32)     # image modality
    x2 = jax.random.normal(k_x2, (B, GENES_DIM), jnp.float32)   # genes modality
    params = init_params(k_params)

    outs = jmvae_forward(x1, x2, params)
    jax.block_until_ready(outs)
    x1_recon, x2_recon, mu, logvar = outs

    assert x1_recon.shape == (B, C, H, W)
    assert x2_recon.shape == (B, GENES_DIM)
    assert mu.shape == (B, LATENT)
    assert logvar.shape == (B, LATENT)

    # Validate against the unfused f32 reference (tolerance covers bf16
    # weights/activations/x1_recon output).
    ref = jmvae_reference(x1, x2, params)
    for name, got, want in zip(("x1_recon", "x2_recon", "mu", "logvar"), outs, ref):
        ok = jnp.allclose(got.astype(jnp.float32), want, atol=5e-2, rtol=5e-2)
        assert ok, f"mismatch in {name}"

    print("KERNEL_OK")
</pallas_src>

<mosaic_0001>
module attributes {stable_mosaic.version = 11 : i64} {
  func.func @jmvae_kernel(%arg0: i32, %arg1: memref<8x1024xbf16, #tpu.memory_space<vmem>>, %arg2: memref<8x32xf32, #tpu.memory_space<vmem>>, %arg3: memref<1024x64xbf16, #tpu.memory_space<vmem>>, %arg4: memref<1x64xf32, #tpu.memory_space<vmem>>, %arg5: memref<32x64xbf16, #tpu.memory_space<vmem>>, %arg6: memref<1x64xf32, #tpu.memory_space<vmem>>, %arg7: memref<64x32xbf16, #tpu.memory_space<vmem>>, %arg8: memref<1x32xf32, #tpu.memory_space<vmem>>, %arg9: memref<64x32xbf16, #tpu.memory_space<vmem>>, %arg10: memref<1x32xf32, #tpu.memory_space<vmem>>, %arg11: memref<32x32xbf16, #tpu.memory_space<vmem>>, %arg12: memref<32x32xbf16, #tpu.memory_space<vmem>>, %arg13: memref<1x32xf32, #tpu.memory_space<vmem>>, %arg14: memref<32x128xbf16, #tpu.memory_space<vmem>>, %arg15: memref<1x128xf32, #tpu.memory_space<vmem>>, %arg16: memref<64x1024xbf16, #tpu.memory_space<vmem>>, %arg17: memref<1x1024xf32, #tpu.memory_space<vmem>>, %arg18: memref<64x32xbf16, #tpu.memory_space<vmem>>, %arg19: memref<1x32xf32, #tpu.memory_space<vmem>>, %arg20: memref<8x1024xbf16, #tpu.memory_space<vmem>>, %arg21: memref<8x64xf32, #tpu.memory_space<vmem>>) attributes {dimension_semantics = [#tpu.dimension_semantics<parallel>], iteration_bounds = array<i64: 1>, scalar_prefetch = 0 : i64, scratch_operands = 0 : i64, tpu.core_type = #tpu.core_type<tc>, window_params = [{transform_indices = @transform_0, window_bounds = array<i64: 8, 1024>}, {transform_indices = @transform_1, window_bounds = array<i64: 8, 32>}, {pipeline_mode = #tpu.pipeline_mode<synchronous>, transform_indices = @transform_2, window_bounds = array<i64: 1024, 64>}, {pipeline_mode = #tpu.pipeline_mode<synchronous>, transform_indices = @transform_3, window_bounds = array<i64: 1, 64>}, {pipeline_mode = #tpu.pipeline_mode<synchronous>, transform_indices = @transform_4, window_bounds = array<i64: 32, 64>}, {pipeline_mode = #tpu.pipeline_mode<synchronous>, transform_indices = @transform_5, window_bounds = array<i64: 1, 64>}, {pipeline_mode = #tpu.pipeline_mode<synchronous>, transform_indices = @transform_6, window_bounds = array<i64: 64, 32>}, {pipeline_mode = #tpu.pipeline_mode<synchronous>, transform_indices = @transform_7, window_bounds = array<i64: 1, 32>}, {pipeline_mode = #tpu.pipeline_mode<synchronous>, transform_indices = @transform_8, window_bounds = array<i64: 64, 32>}, {pipeline_mode = #tpu.pipeline_mode<synchronous>, transform_indices = @transform_9, window_bounds = array<i64: 1, 32>}, {pipeline_mode = #tpu.pipeline_mode<synchronous>, transform_indices = @transform_10, window_bounds = array<i64: 32, 32>}, {pipeline_mode = #tpu.pipeline_mode<synchronous>, transform_indices = @transform_11, window_bounds = array<i64: 32, 32>}, {pipeline_mode = #tpu.pipeline_mode<synchronous>, transform_indices = @transform_12, window_bounds = array<i64: 1, 32>}, {pipeline_mode = #tpu.pipeline_mode<synchronous>, transform_indices = @transform_13, window_bounds = array<i64: 32, 128>}, {pipeline_mode = #tpu.pipeline_mode<synchronous>, transform_indices = @transform_14, window_bounds = array<i64: 1, 128>}, {pipeline_mode = #tpu.pipeline_mode<synchronous>, transform_indices = @transform_15, window_bounds = array<i64: 64, 1024>}, {pipeline_mode = #tpu.pipeline_mode<synchronous>, transform_indices = @transform_16, window_bounds = array<i64: 1, 1024>}, {pipeline_mode = #tpu.pipeline_mode<synchronous>, transform_indices = @transform_17, window_bounds = array<i64: 64, 32>}, {pipeline_mode = #tpu.pipeline_mode<synchronous>, transform_indices = @transform_18, window_bounds = array<i64: 1, 32>}, {transform_indices = @transform_19, window_bounds = array<i64: 8, 1024>}, {transform_indices = @transform_20, window_bounds = array<i64: 8, 64>}]} {
    %c0 = arith.constant 0 : index
    %c0_0 = arith.constant 0 : index
    %0 = vector.load %arg1[%c0, %c0_0] : memref<8x1024xbf16, #tpu.memory_space<vmem>>, vector<8x1024xbf16>
    %c0_1 = arith.constant 0 : index
    %c0_2 = arith.constant 0 : index
    %1 = vector.load %arg2[%c0_1, %c0_2] : memref<8x32xf32, #tpu.memory_space<vmem>>, vector<8x32xf32>
    %c0_3 = arith.constant 0 : index
    %c0_4 = arith.constant 0 : index
    %2 = vector.load %arg3[%c0_3, %c0_4] : memref<1024x64xbf16, #tpu.memory_space<vmem>>, vector<1024x64xbf16>
    %cst = arith.constant dense<0.000000e+00> : vector<8x64xf32>
    %3 = tpu.matmul %0, %2, %cst {dimension_numbers = #tpu.dot_dimension_numbers<[1], [0], [0], [1], [0, 0, 1, 1], [], []>} : vector<8x1024xbf16>, vector<1024x64xbf16>, vector<8x64xf32> -> vector<8x64xf32>
    %c0_5 = arith.constant 0 : index
    %c0_6 = arith.constant 0 : index
    %4 = vector.load %arg4[%c0_5, %c0_6] : memref<1x64xf32, #tpu.memory_space<vmem>>, vector<1x64xf32>
    %5 = vector.broadcast %4 : vector<1x64xf32> to vector<8x64xf32>
    %6 = arith.addf %3, %5 : vector<8x64xf32>
    %cst_7 = arith.constant 0.000000e+00 : f32
    %7 = vector.broadcast %cst_7 : f32 to vector<8x64xf32>
    %8 = arith.maximumf %6, %7 : vector<8x64xf32>
    %9 = arith.truncf %1 : vector<8x32xf32> to vector<8x32xbf16>
    %c0_8 = arith.constant 0 : index
    %c0_9 = arith.constant 0 : index
    %10 = vector.load %arg5[%c0_8, %c0_9] : memref<32x64xbf16, #tpu.memory_space<vmem>>, vector<32x64xbf16>
    %cst_10 = arith.constant dense<0.000000e+00> : vector<8x64xf32>
    %11 = tpu.matmul %9, %10, %cst_10 {dimension_numbers = #tpu.dot_dimension_numbers<[1], [0], [0], [1], [0, 0, 1, 1], [], []>} : vector<8x32xbf16>, vector<32x64xbf16>, vector<8x64xf32> -> vector<8x64xf32>
    %c0_11 = arith.constant 0 : index
    %c0_12 = arith.constant 0 : index
    %12 = vector.load %arg6[%c0_11, %c0_12] : memref<1x64xf32, #tpu.memory_space<vmem>>, vector<1x64xf32>
    %13 = vector.broadcast %12 : vector<1x64xf32> to vector<8x64xf32>
    %14 = arith.addf %11, %13 : vector<8x64xf32>
    %cst_13 = arith.constant 0.000000e+00 : f32
    %15 = vector.broadcast %cst_13 : f32 to vector<8x64xf32>
    %16 = arith.maximumf %14, %15 : vector<8x64xf32>
    %17 = arith.truncf %8 : vector<8x64xf32> to vector<8x64xbf16>
    %c0_14 = arith.constant 0 : index
    %c0_15 = arith.constant 0 : index
    %18 = vector.load %arg7[%c0_14, %c0_15] : memref<64x32xbf16, #tpu.memory_space<vmem>>, vector<64x32xbf16>
    %cst_16 = arith.constant dense<0.000000e+00> : vector<8x32xf32>
    %19 = tpu.matmul %17, %18, %cst_16 {dimension_numbers = #tpu.dot_dimension_numbers<[1], [0], [0], [1], [0, 0, 1, 1], [], []>} : vector<8x64xbf16>, vector<64x32xbf16>, vector<8x32xf32> -> vector<8x32xf32>
    %c0_17 = arith.constant 0 : index
    %c0_18 = arith.constant 0 : index
    %20 = vector.load %arg8[%c0_17, %c0_18] : memref<1x32xf32, #tpu.memory_space<vmem>>, vector<1x32xf32>
    %21 = vector.broadcast %20 : vector<1x32xf32> to vector<8x32xf32>
    %22 = arith.addf %19, %21 : vector<8x32xf32>
    %23 = arith.truncf %16 : vector<8x64xf32> to vector<8x64xbf16>
    %c0_19 = arith.constant 0 : index
    %c0_20 = arith.constant 0 : index
    %24 = vector.load %arg9[%c0_19, %c0_20] : memref<64x32xbf16, #tpu.memory_space<vmem>>, vector<64x32xbf16>
    %cst_21 = arith.constant dense<0.000000e+00> : vector<8x32xf32>
    %25 = tpu.matmul %23, %24, %cst_21 {dimension_numbers = #tpu.dot_dimension_numbers<[1], [0], [0], [1], [0, 0, 1, 1], [], []>} : vector<8x64xbf16>, vector<64x32xbf16>, vector<8x32xf32> -> vector<8x32xf32>
    %c0_22 = arith.constant 0 : index
    %c0_23 = arith.constant 0 : index
    %26 = vector.load %arg10[%c0_22, %c0_23] : memref<1x32xf32, #tpu.memory_space<vmem>>, vector<1x32xf32>
    %27 = vector.broadcast %26 : vector<1x32xf32> to vector<8x32xf32>
    %28 = arith.addf %25, %27 : vector<8x32xf32>
    %29 = arith.truncf %22 : vector<8x32xf32> to vector<8x32xbf16>
    %c0_24 = arith.constant 0 : index
    %c0_25 = arith.constant 0 : index
    %30 = vector.load %arg11[%c0_24, %c0_25] : memref<32x32xbf16, #tpu.memory_space<vmem>>, vector<32x32xbf16>
    %cst_26 = arith.constant dense<0.000000e+00> : vector<8x32xf32>
    %31 = tpu.matmul %29, %30, %cst_26 {dimension_numbers = #tpu.dot_dimension_numbers<[1], [0], [0], [1], [0, 0, 1, 1], [], []>} : vector<8x32xbf16>, vector<32x32xbf16>, vector<8x32xf32> -> vector<8x32xf32>
    %32 = arith.truncf %28 : vector<8x32xf32> to vector<8x32xbf16>
    %c0_27 = arith.constant 0 : index
    %c0_28 = arith.constant 0 : index
    %33 = vector.load %arg12[%c0_27, %c0_28] : memref<32x32xbf16, #tpu.memory_space<vmem>>, vector<32x32xbf16>
    %cst_29 = arith.constant dense<0.000000e+00> : vector<8x32xf32>
    %34 = tpu.matmul %32, %33, %cst_29 {dimension_numbers = #tpu.dot_dimension_numbers<[1], [0], [0], [1], [0, 0, 1, 1], [], []>} : vector<8x32xbf16>, vector<32x32xbf16>, vector<8x32xf32> -> vector<8x32xf32>
    %35 = arith.addf %31, %34 : vector<8x32xf32>
    %c0_30 = arith.constant 0 : index
    %c0_31 = arith.constant 0 : index
    %36 = vector.load %arg13[%c0_30, %c0_31] : memref<1x32xf32, #tpu.memory_space<vmem>>, vector<1x32xf32>
    %37 = vector.broadcast %36 : vector<1x32xf32> to vector<8x32xf32>
    %38 = arith.addf %35, %37 : vector<8x32xf32>
    %39 = arith.truncf %38 : vector<8x32xf32> to vector<8x32xbf16>
    %c0_32 = arith.constant 0 : index
    %c0_33 = arith.constant 0 : index
    %40 = vector.load %arg14[%c0_32, %c0_33] : memref<32x128xbf16, #tpu.memory_space<vmem>>, vector<32x128xbf16>
    %cst_34 = arith.constant dense<0.000000e+00> : vector<8x128xf32>
    %41 = tpu.matmul %39, %40, %cst_34 {dimension_numbers = #tpu.dot_dimension_numbers<[1], [0], [0], [1], [0, 0, 1, 1], [], []>} : vector<8x32xbf16>, vector<32x128xbf16>, vector<8x128xf32> -> vector<8x128xf32>
    %c0_35 = arith.constant 0 : index
    %c0_36 = arith.constant 0 : index
    %42 = vector.load %arg15[%c0_35, %c0_36] : memref<1x128xf32, #tpu.memory_space<vmem>>, vector<1x128xf32>
    %43 = vector.broadcast %42 : vector<1x128xf32> to vector<8x128xf32>
    %44 = arith.addf %41, %43 : vector<8x128xf32>
    %cst_37 = arith.constant 0.000000e+00 : f32
    %45 = vector.broadcast %cst_37 : f32 to vector<8x128xf32>
    %46 = arith.maximumf %44, %45 : vector<8x128xf32>
    %47 = vector.extract_strided_slice %46 {offsets = [0, 0], sizes = [8, 64], strides = [1, 1]} : vector<8x128xf32> to vector<8x64xf32>
    %48 = vector.extract_strided_slice %46 {offsets = [0, 64], sizes = [8, 64], strides = [1, 1]} : vector<8x128xf32> to vector<8x64xf32>
    %49 = arith.truncf %47 : vector<8x64xf32> to vector<8x64xbf16>
    %c0_38 = arith.constant 0 : index
    %c0_39 = arith.constant 0 : index
    %50 = vector.load %arg16[%c0_38, %c0_39] : memref<64x1024xbf16, #tpu.memory_space<vmem>>, vector<64x1024xbf16>
    %cst_40 = arith.constant dense<0.000000e+00> : vector<8x1024xf32>
    %51 = tpu.matmul %49, %50, %cst_40 {dimension_numbers = #tpu.dot_dimension_numbers<[1], [0], [0], [1], [0, 0, 1, 1], [], []>} : vector<8x64xbf16>, vector<64x1024xbf16>, vector<8x1024xf32> -> vector<8x1024xf32>
    %c0_41 = arith.constant 0 : index
    %c0_42 = arith.constant 0 : index
    %52 = vector.load %arg17[%c0_41, %c0_42] : memref<1x1024xf32, #tpu.memory_space<vmem>>, vector<1x1024xf32>
    %53 = vector.broadcast %52 : vector<1x1024xf32> to vector<8x1024xf32>
    %54 = arith.addf %51, %53 : vector<8x1024xf32>
    %55 = arith.negf %54 : vector<8x1024xf32>
    %56 = math.exp %55 : vector<8x1024xf32>
    %cst_43 = arith.constant 1.000000e+00 : f32
    %57 = vector.broadcast %cst_43 : f32 to vector<8x1024xf32>
    %58 = arith.addf %57, %56 : vector<8x1024xf32>
    %59 = arith.divf %57, %58 : vector<8x1024xf32>
    %60 = arith.truncf %59 : vector<8x1024xf32> to vector<8x1024xbf16>
    %c0_44 = arith.constant 0 : index
    %c0_45 = arith.constant 0 : index
    %61 = vector.load %arg20[%c0_44, %c0_45] : memref<8x1024xbf16, #tpu.memory_space<vmem>>, vector<8x1024xbf16>
    tpu.vector_store %arg20[%c0_44, %c0_45], %60 {strides = array<i32>} : memref<8x1024xbf16, #tpu.memory_space<vmem>>, vector<8x1024xbf16>,
    %62 = arith.truncf %48 : vector<8x64xf32> to vector<8x64xbf16>
    %c0_46 = arith.constant 0 : index
    %c0_47 = arith.constant 0 : index
    %63 = vector.load %arg18[%c0_46, %c0_47] : memref<64x32xbf16, #tpu.memory_space<vmem>>, vector<64x32xbf16>
    %cst_48 = arith.constant dense<0.000000e+00> : vector<8x32xf32>
    %64 = tpu.matmul %62, %63, %cst_48 {dimension_numbers = #tpu.dot_dimension_numbers<[1], [0], [0], [1], [0, 0, 1, 1], [], []>} : vector<8x64xbf16>, vector<64x32xbf16>, vector<8x32xf32> -> vector<8x32xf32>
    %c0_49 = arith.constant 0 : index
    %c0_50 = arith.constant 0 : index
    %65 = vector.load %arg19[%c0_49, %c0_50] : memref<1x32xf32, #tpu.memory_space<vmem>>, vector<1x32xf32>
    %66 = vector.broadcast %65 : vector<1x32xf32> to vector<8x32xf32>
    %67 = arith.addf %64, %66 : vector<8x32xf32>
    %68 = arith.negf %67 : vector<8x32xf32>
    %69 = math.exp %68 : vector<8x32xf32>
    %cst_51 = arith.constant 1.000000e+00 : f32
    %70 = vector.broadcast %cst_51 : f32 to vector<8x32xf32>
    %71 = arith.addf %70, %69 : vector<8x32xf32>
    %72 = arith.divf %70, %71 : vector<8x32xf32>
    %73 = tpu.concatenate %38, %72 in 1 : vector<8x32xf32>, vector<8x32xf32> -> vector<8x64xf32>
    %c0_52 = arith.constant 0 : index
    %c0_53 = arith.constant 0 : index
    %74 = vector.load %arg21[%c0_52, %c0_53] : memref<8x64xf32, #tpu.memory_space<vmem>>, vector<8x64xf32>
    tpu.vector_store %arg21[%c0_52, %c0_53], %73 {strides = array<i32>} : memref<8x64xf32, #tpu.memory_space<vmem>>, vector<8x64xf32>,
    return
  }
  func.func @transform_0(%arg0: i32) -> (i32, i32) {
    %c0_i32 = arith.constant 0 : i32
    %c0_i32_0 = arith.constant 0 : i32
    return %arg0, %c0_i32 : i32, i32
  }
  func.func @transform_1(%arg0: i32) -> (i32, i32) {
    %c0_i32 = arith.constant 0 : i32
    %c0_i32_0 = arith.constant 0 : i32
    return %arg0, %c0_i32 : i32, i32
  }
  func.func @transform_2(%arg0: i32) -> (i32, i32) {
    %c0_i32 = arith.constant 0 : i32
    %c0_i32_0 = arith.constant 0 : i32
    %c0_i32_1 = arith.constant 0 : i32
    return %c0_i32, %c0_i32_0 : i32, i32
  }
  func.func @transform_3(%arg0: i32) -> (i32, i32) {
    %c0_i32 = arith.constant 0 : i32
    %c0_i32_0 = arith.constant 0 : i32
    %c0_i32_1 = arith.constant 0 : i32
    return %c0_i32, %c0_i32_0 : i32, i32
  }
  func.func @transform_4(%arg0: i32) -> (i32, i32) {
    %c0_i32 = arith.constant 0 : i32
    %c0_i32_0 = arith.constant 0 : i32
    %c0_i32_1 = arith.constant 0 : i32
    return %c0_i32, %c0_i32_0 : i32, i32
  }
  func.func @transform_5(%arg0: i32) -> (i32, i32) {
    %c0_i32 = arith.constant 0 : i32
    %c0_i32_0 = arith.constant 0 : i32
    %c0_i32_1 = arith.constant 0 : i32
    return %c0_i32, %c0_i32_0 : i32, i32
  }
  func.func @transform_6(%arg0: i32) -> (i32, i32) {
    %c0_i32 = arith.constant 0 : i32
    %c0_i32_0 = arith.constant 0 : i32
    %c0_i32_1 = arith.constant 0 : i32
    return %c0_i32, %c0_i32_0 : i32, i32
  }
  func.func @transform_7(%arg0: i32) -> (i32, i32) {
    %c0_i32 = arith.constant 0 : i32
    %c0_i32_0 = arith.constant 0 : i32
    %c0_i32_1 = arith.constant 0 : i32
    return %c0_i32, %c0_i32_0 : i32, i32
  }
  func.func @transform_8(%arg0: i32) -> (i32, i32) {
    %c0_i32 = arith.constant 0 : i32
    %c0_i32_0 = arith.constant 0 : i32
    %c0_i32_1 = arith.constant 0 : i32
    return %c0_i32, %c0_i32_0 : i32, i32
  }
  func.func @transform_9(%arg0: i32) -> (i32, i32) {
    %c0_i32 = arith.constant 0 : i32
    %c0_i32_0 = arith.constant 0 : i32
    %c0_i32_1 = arith.constant 0 : i32
    return %c0_i32, %c0_i32_0 : i32, i32
  }
  func.func @transform_10(%arg0: i32) -> (i32, i32) {
    %c0_i32 = arith.constant 0 : i32
    %c0_i32_0 = arith.constant 0 : i32
    %c0_i32_1 = arith.constant 0 : i32
    return %c0_i32, %c0_i32_0 : i32, i32
  }
  func.func @transform_11(%arg0: i32) -> (i32, i32) {
    %c0_i32 = arith.constant 0 : i32
    %c0_i32_0 = arith.constant 0 : i32
    %c0_i32_1 = arith.constant 0 : i32
    return %c0_i32, %c0_i32_0 : i32, i32
  }
  func.func @transform_12(%arg0: i32) -> (i32, i32) {
    %c0_i32 = arith.constant 0 : i32
    %c0_i32_0 = arith.constant 0 : i32
    %c0_i32_1 = arith.constant 0 : i32
    return %c0_i32, %c0_i32_0 : i32, i32
  }
  func.func @transform_13(%arg0: i32) -> (i32, i32) {
    %c0_i32 = arith.constant 0 : i32
    %c0_i32_0 = arith.constant 0 : i32
    %c0_i32_1 = arith.constant 0 : i32
    return %c0_i32, %c0_i32_0 : i32, i32
  }
  func.func @transform_14(%arg0: i32) -> (i32, i32) {
    %c0_i32 = arith.constant 0 : i32
    %c0_i32_0 = arith.constant 0 : i32
    %c0_i32_1 = arith.constant 0 : i32
    return %c0_i32, %c0_i32_0 : i32, i32
  }
  func.func @transform_15(%arg0: i32) -> (i32, i32) {
    %c0_i32 = arith.constant 0 : i32
    %c0_i32_0 = arith.constant 0 : i32
    %c0_i32_1 = arith.constant 0 : i32
    return %c0_i32, %c0_i32_0 : i32, i32
  }
  func.func @transform_16(%arg0: i32) -> (i32, i32) {
    %c0_i32 = arith.constant 0 : i32
    %c0_i32_0 = arith.constant 0 : i32
    %c0_i32_1 = arith.constant 0 : i32
    return %c0_i32, %c0_i32_0 : i32, i32
  }
  func.func @transform_17(%arg0: i32) -> (i32, i32) {
    %c0_i32 = arith.constant 0 : i32
    %c0_i32_0 = arith.constant 0 : i32
    %c0_i32_1 = arith.constant 0 : i32
    return %c0_i32, %c0_i32_0 : i32, i32
  }
  func.func @transform_18(%arg0: i32) -> (i32, i32) {
    %c0_i32 = arith.constant 0 : i32
    %c0_i32_0 = arith.constant 0 : i32
    %c0_i32_1 = arith.constant 0 : i32
    return %c0_i32, %c0_i32_0 : i32, i32
  }
  func.func @transform_19(%arg0: i32) -> (i32, i32) {
    %c0_i32 = arith.constant 0 : i32
    %c0_i32_0 = arith.constant 0 : i32
    return %arg0, %c0_i32 : i32, i32
  }
  func.func @transform_20(%arg0: i32) -> (i32, i32) {
    %c0_i32 = arith.constant 0 : i32
    %c0_i32_0 = arith.constant 0 : i32
    return %arg0, %c0_i32 : i32, i32
  }
}

module attributes {stable_mosaic.version = 11 : i64} {
  func.func @jmvae_kernel(%arg0: i32, %arg1: memref<8x1024xbf16, #tpu.memory_space<vmem>>, %arg2: memref<8x32xf32, #tpu.memory_space<vmem>>, %arg3: memref<1024x64xbf16, #tpu.memory_space<vmem>>, %arg4: memref<1x64xf32, #tpu.memory_space<vmem>>, %arg5: memref<32x64xbf16, #tpu.memory_space<vmem>>, %arg6: memref<1x64xf32, #tpu.memory_space<vmem>>, %arg7: memref<64x32xbf16, #tpu.memory_space<vmem>>, %arg8: memref<1x32xf32, #tpu.memory_space<vmem>>, %arg9: memref<64x32xbf16, #tpu.memory_space<vmem>>, %arg10: memref<1x32xf32, #tpu.memory_space<vmem>>, %arg11: memref<32x32xbf16, #tpu.memory_space<vmem>>, %arg12: memref<32x32xbf16, #tpu.memory_space<vmem>>, %arg13: memref<1x32xf32, #tpu.memory_space<vmem>>, %arg14: memref<32x128xbf16, #tpu.memory_space<vmem>>, %arg15: memref<1x128xf32, #tpu.memory_space<vmem>>, %arg16: memref<64x1024xbf16, #tpu.memory_space<vmem>>, %arg17: memref<1x1024xf32, #tpu.memory_space<vmem>>, %arg18: memref<64x32xbf16, #tpu.memory_space<vmem>>, %arg19: memref<1x32xf32, #tpu.memory_space<vmem>>, %arg20: memref<8x1024xbf16, #tpu.memory_space<vmem>>, %arg21: memref<8x64xf32, #tpu.memory_space<vmem>>) attributes {dimension_semantics = [#tpu.dimension_semantics<parallel>], iteration_bounds = array<i64: 1>, scalar_prefetch = 0 : i64, scratch_operands = 0 : i64, tpu.core_type = #tpu.core_type<tc>, window_params = [{transform_indices = @transform_0, window_bounds = array<i64: 8, 1024>}, {transform_indices = @transform_1, window_bounds = array<i64: 8, 32>}, {pipeline_mode = #tpu.pipeline_mode<synchronous>, transform_indices = @transform_2, window_bounds = array<i64: 1024, 64>}, {pipeline_mode = #tpu.pipeline_mode<synchronous>, transform_indices = @transform_3, window_bounds = array<i64: 1, 64>}, {pipeline_mode = #tpu.pipeline_mode<synchronous>, transform_indices = @transform_4, window_bounds = array<i64: 32, 64>}, {pipeline_mode = #tpu.pipeline_mode<synchronous>, transform_indices = @transform_5, window_bounds = array<i64: 1, 64>}, {pipeline_mode = #tpu.pipeline_mode<synchronous>, transform_indices = @transform_6, window_bounds = array<i64: 64, 32>}, {pipeline_mode = #tpu.pipeline_mode<synchronous>, transform_indices = @transform_7, window_bounds = array<i64: 1, 32>}, {pipeline_mode = #tpu.pipeline_mode<synchronous>, transform_indices = @transform_8, window_bounds = array<i64: 64, 32>}, {pipeline_mode = #tpu.pipeline_mode<synchronous>, transform_indices = @transform_9, window_bounds = array<i64: 1, 32>}, {pipeline_mode = #tpu.pipeline_mode<synchronous>, transform_indices = @transform_10, window_bounds = array<i64: 32, 32>}, {pipeline_mode = #tpu.pipeline_mode<synchronous>, transform_indices = @transform_11, window_bounds = array<i64: 32, 32>}, {pipeline_mode = #tpu.pipeline_mode<synchronous>, transform_indices = @transform_12, window_bounds = array<i64: 1, 32>}, {pipeline_mode = #tpu.pipeline_mode<synchronous>, transform_indices = @transform_13, window_bounds = array<i64: 32, 128>}, {pipeline_mode = #tpu.pipeline_mode<synchronous>, transform_indices = @transform_14, window_bounds = array<i64: 1, 128>}, {pipeline_mode = #tpu.pipeline_mode<synchronous>, transform_indices = @transform_15, window_bounds = array<i64: 64, 1024>}, {pipeline_mode = #tpu.pipeline_mode<synchronous>, transform_indices = @transform_16, window_bounds = array<i64: 1, 1024>}, {pipeline_mode = #tpu.pipeline_mode<synchronous>, transform_indices = @transform_17, window_bounds = array<i64: 64, 32>}, {pipeline_mode = #tpu.pipeline_mode<synchronous>, transform_indices = @transform_18, window_bounds = array<i64: 1, 32>}, {transform_indices = @transform_19, window_bounds = array<i64: 8, 1024>}, {transform_indices = @transform_20, window_bounds = array<i64: 8, 64>}]} {
    %c0 = arith.constant 0 : index
    %c0_0 = arith.constant 0 : index
    %0 = vector.load %arg1[%c0, %c0_0] : memref<8x1024xbf16, #tpu.memory_space<vmem>>, vector<8x1024xbf16>
    %c0_1 = arith.constant 0 : index
    %c0_2 = arith.constant 0 : index
    %1 = vector.load %arg2[%c0_1, %c0_2] : memref<8x32xf32, #tpu.memory_space<vmem>>, vector<8x32xf32>
    %c0_3 = arith.constant 0 : index
    %c0_4 = arith.constant 0 : index
    %2 = vector.load %arg3[%c0_3, %c0_4] : memref<1024x64xbf16, #tpu.memory_space<vmem>>, vector<1024x64xbf16>
    %cst = arith.constant dense<0.000000e+00> : vector<8x64xf32>
    %3 = tpu.matmul %0, %2, %cst {dimension_numbers = #tpu.dot_dimension_numbers<[1], [0], [0], [1], [0, 0, 1, 1], [], []>} : vector<8x1024xbf16>, vector<1024x64xbf16>, vector<8x64xf32> -> vector<8x64xf32>
    %c0_5 = arith.constant 0 : index
    %c0_6 = arith.constant 0 : index
    %4 = vector.load %arg4[%c0_5, %c0_6] : memref<1x64xf32, #tpu.memory_space<vmem>>, vector<1x64xf32>
    %5 = vector.broadcast %4 : vector<1x64xf32> to vector<8x64xf32>
    %6 = arith.addf %3, %5 : vector<8x64xf32>
    %cst_7 = arith.constant 0.000000e+00 : f32
    %7 = vector.broadcast %cst_7 : f32 to vector<8x64xf32>
    %8 = arith.maximumf %6, %7 : vector<8x64xf32>
    %9 = arith.truncf %1 : vector<8x32xf32> to vector<8x32xbf16>
    %c0_8 = arith.constant 0 : index
    %c0_9 = arith.constant 0 : index
    %10 = vector.load %arg5[%c0_8, %c0_9] : memref<32x64xbf16, #tpu.memory_space<vmem>>, vector<32x64xbf16>
    %cst_10 = arith.constant dense<0.000000e+00> : vector<8x64xf32>
    %11 = tpu.matmul %9, %10, %cst_10 {dimension_numbers = #tpu.dot_dimension_numbers<[1], [0], [0], [1], [0, 0, 1, 1], [], []>} : vector<8x32xbf16>, vector<32x64xbf16>, vector<8x64xf32> -> vector<8x64xf32>
    %c0_11 = arith.constant 0 : index
    %c0_12 = arith.constant 0 : index
    %12 = vector.load %arg6[%c0_11, %c0_12] : memref<1x64xf32, #tpu.memory_space<vmem>>, vector<1x64xf32>
    %13 = vector.broadcast %12 : vector<1x64xf32> to vector<8x64xf32>
    %14 = arith.addf %11, %13 : vector<8x64xf32>
    %cst_13 = arith.constant 0.000000e+00 : f32
    %15 = vector.broadcast %cst_13 : f32 to vector<8x64xf32>
    %16 = arith.maximumf %14, %15 : vector<8x64xf32>
    %17 = arith.truncf %8 : vector<8x64xf32> to vector<8x64xbf16>
    %c0_14 = arith.constant 0 : index
    %c0_15 = arith.constant 0 : index
    %18 = vector.load %arg7[%c0_14, %c0_15] : memref<64x32xbf16, #tpu.memory_space<vmem>>, vector<64x32xbf16>
    %cst_16 = arith.constant dense<0.000000e+00> : vector<8x32xf32>
    %19 = tpu.matmul %17, %18, %cst_16 {dimension_numbers = #tpu.dot_dimension_numbers<[1], [0], [0], [1], [0, 0, 1, 1], [], []>} : vector<8x64xbf16>, vector<64x32xbf16>, vector<8x32xf32> -> vector<8x32xf32>
    %c0_17 = arith.constant 0 : index
    %c0_18 = arith.constant 0 : index
    %20 = vector.load %arg8[%c0_17, %c0_18] : memref<1x32xf32, #tpu.memory_space<vmem>>, vector<1x32xf32>
    %21 = vector.broadcast %20 : vector<1x32xf32> to vector<8x32xf32>
    %22 = arith.addf %19, %21 : vector<8x32xf32>
    %23 = arith.truncf %16 : vector<8x64xf32> to vector<8x64xbf16>
    %c0_19 = arith.constant 0 : index
    %c0_20 = arith.constant 0 : index
    %24 = vector.load %arg9[%c0_19, %c0_20] : memref<64x32xbf16, #tpu.memory_space<vmem>>, vector<64x32xbf16>
    %cst_21 = arith.constant dense<0.000000e+00> : vector<8x32xf32>
    %25 = tpu.matmul %23, %24, %cst_21 {dimension_numbers = #tpu.dot_dimension_numbers<[1], [0], [0], [1], [0, 0, 1, 1], [], []>} : vector<8x64xbf16>, vector<64x32xbf16>, vector<8x32xf32> -> vector<8x32xf32>
    %c0_22 = arith.constant 0 : index
    %c0_23 = arith.constant 0 : index
    %26 = vector.load %arg10[%c0_22, %c0_23] : memref<1x32xf32, #tpu.memory_space<vmem>>, vector<1x32xf32>
    %27 = vector.broadcast %26 : vector<1x32xf32> to vector<8x32xf32>
    %28 = arith.addf %25, %27 : vector<8x32xf32>
    %29 = arith.truncf %22 : vector<8x32xf32> to vector<8x32xbf16>
    %c0_24 = arith.constant 0 : index
    %c0_25 = arith.constant 0 : index
    %30 = vector.load %arg11[%c0_24, %c0_25] : memref<32x32xbf16, #tpu.memory_space<vmem>>, vector<32x32xbf16>
    %cst_26 = arith.constant dense<0.000000e+00> : vector<8x32xf32>
    %31 = tpu.matmul %29, %30, %cst_26 {dimension_numbers = #tpu.dot_dimension_numbers<[1], [0], [0], [1], [0, 0, 1, 1], [], []>} : vector<8x32xbf16>, vector<32x32xbf16>, vector<8x32xf32> -> vector<8x32xf32>
    %32 = arith.truncf %28 : vector<8x32xf32> to vector<8x32xbf16>
    %c0_27 = arith.constant 0 : index
    %c0_28 = arith.constant 0 : index
    %33 = vector.load %arg12[%c0_27, %c0_28] : memref<32x32xbf16, #tpu.memory_space<vmem>>, vector<32x32xbf16>
    %cst_29 = arith.constant dense<0.000000e+00> : vector<8x32xf32>
    %34 = tpu.matmul %32, %33, %cst_29 {dimension_numbers = #tpu.dot_dimension_numbers<[1], [0], [0], [1], [0, 0, 1, 1], [], []>} : vector<8x32xbf16>, vector<32x32xbf16>, vector<8x32xf32> -> vector<8x32xf32>
    %35 = arith.addf %31, %34 : vector<8x32xf32>
    %c0_30 = arith.constant 0 : index
    %c0_31 = arith.constant 0 : index
    %36 = vector.load %arg13[%c0_30, %c0_31] : memref<1x32xf32, #tpu.memory_space<vmem>>, vector<1x32xf32>
    %37 = vector.broadcast %36 : vector<1x32xf32> to vector<8x32xf32>
    %38 = arith.addf %35, %37 : vector<8x32xf32>
    %39 = arith.truncf %38 : vector<8x32xf32> to vector<8x32xbf16>
    %c0_32 = arith.constant 0 : index
    %c0_33 = arith.constant 0 : index
    %40 = vector.load %arg14[%c0_32, %c0_33] : memref<32x128xbf16, #tpu.memory_space<vmem>>, vector<32x128xbf16>
    %cst_34 = arith.constant dense<0.000000e+00> : vector<8x128xf32>
    %41 = tpu.matmul %39, %40, %cst_34 {dimension_numbers = #tpu.dot_dimension_numbers<[1], [0], [0], [1], [0, 0, 1, 1], [], []>} : vector<8x32xbf16>, vector<32x128xbf16>, vector<8x128xf32> -> vector<8x128xf32>
    %c0_35 = arith.constant 0 : index
    %c0_36 = arith.constant 0 : index
    %42 = vector.load %arg15[%c0_35, %c0_36] : memref<1x128xf32, #tpu.memory_space<vmem>>, vector<1x128xf32>
    %43 = vector.broadcast %42 : vector<1x128xf32> to vector<8x128xf32>
    %44 = arith.addf %41, %43 : vector<8x128xf32>
    %cst_37 = arith.constant 0.000000e+00 : f32
    %45 = vector.broadcast %cst_37 : f32 to vector<8x128xf32>
    %46 = arith.maximumf %44, %45 : vector<8x128xf32>
    %47 = vector.extract_strided_slice %46 {offsets = [0, 0], sizes = [8, 64], strides = [1, 1]} : vector<8x128xf32> to vector<8x64xf32>
    %48 = vector.extract_strided_slice %46 {offsets = [0, 64], sizes = [8, 64], strides = [1, 1]} : vector<8x128xf32> to vector<8x64xf32>
    %49 = arith.truncf %47 : vector<8x64xf32> to vector<8x64xbf16>
    %c0_38 = arith.constant 0 : index
    %c0_39 = arith.constant 0 : index
    %50 = vector.load %arg16[%c0_38, %c0_39] : memref<64x1024xbf16, #tpu.memory_space<vmem>>, vector<64x1024xbf16>
    %cst_40 = arith.constant dense<0.000000e+00> : vector<8x1024xf32>
    %51 = tpu.matmul %49, %50, %cst_40 {dimension_numbers = #tpu.dot_dimension_numbers<[1], [0], [0], [1], [0, 0, 1, 1], [], []>} : vector<8x64xbf16>, vector<64x1024xbf16>, vector<8x1024xf32> -> vector<8x1024xf32>
    %c0_41 = arith.constant 0 : index
    %c0_42 = arith.constant 0 : index
    %52 = vector.load %arg17[%c0_41, %c0_42] : memref<1x1024xf32, #tpu.memory_space<vmem>>, vector<1x1024xf32>
    %53 = vector.broadcast %52 : vector<1x1024xf32> to vector<8x1024xf32>
    %54 = arith.addf %51, %53 : vector<8x1024xf32>
    %55 = arith.negf %54 : vector<8x1024xf32>
    %56 = math.exp %55 : vector<8x1024xf32>
    %cst_43 = arith.constant 1.000000e+00 : f32
    %57 = vector.broadcast %cst_43 : f32 to vector<8x1024xf32>
    %58 = arith.addf %57, %56 : vector<8x1024xf32>
    %59 = arith.divf %57, %58 : vector<8x1024xf32>
    %60 = arith.truncf %59 : vector<8x1024xf32> to vector<8x1024xbf16>
    %c0_44 = arith.constant 0 : index
    %c0_45 = arith.constant 0 : index
    %61 = vector.load %arg20[%c0_44, %c0_45] : memref<8x1024xbf16, #tpu.memory_space<vmem>>, vector<8x1024xbf16>
    tpu.vector_store %arg20[%c0_44, %c0_45], %60 {strides = array<i32>} : memref<8x1024xbf16, #tpu.memory_space<vmem>>, vector<8x1024xbf16>,
    %62 = arith.truncf %48 : vector<8x64xf32> to vector<8x64xbf16>
    %c0_46 = arith.constant 0 : index
    %c0_47 = arith.constant 0 : index
    %63 = vector.load %arg18[%c0_46, %c0_47] : memref<64x32xbf16, #tpu.memory_space<vmem>>, vector<64x32xbf16>
    %cst_48 = arith.constant dense<0.000000e+00> : vector<8x32xf32>
    %64 = tpu.matmul %62, %63, %cst_48 {dimension_numbers = #tpu.dot_dimension_numbers<[1], [0], [0], [1], [0, 0, 1, 1], [], []>} : vector<8x64xbf16>, vector<64x32xbf16>, vector<8x32xf32> -> vector<8x32xf32>
    %c0_49 = arith.constant 0 : index
    %c0_50 = arith.constant 0 : index
    %65 = vector.load %arg19[%c0_49, %c0_50] : memref<1x32xf32, #tpu.memory_space<vmem>>, vector<1x32xf32>
    %66 = vector.broadcast %65 : vector<1x32xf32> to vector<8x32xf32>
    %67 = arith.addf %64, %66 : vector<8x32xf32>
    %68 = arith.negf %67 : vector<8x32xf32>
    %69 = math.exp %68 : vector<8x32xf32>
    %cst_51 = arith.constant 1.000000e+00 : f32
    %70 = vector.broadcast %cst_51 : f32 to vector<8x32xf32>
    %71 = arith.addf %70, %69 : vector<8x32xf32>
    %72 = arith.divf %70, %71 : vector<8x32xf32>
    %73 = tpu.concatenate %38, %72 in 1 : vector<8x32xf32>, vector<8x32xf32> -> vector<8x64xf32>
    %c0_52 = arith.constant 0 : index
    %c0_53 = arith.constant 0 : index
    %74 = vector.load %arg21[%c0_52, %c0_53] : memref<8x64xf32, #tpu.memory_space<vmem>>, vector<8x64xf32>
    tpu.vector_store %arg21[%c0_52, %c0_53], %73 {strides = array<i32>} : memref<8x64xf32, #tpu.memory_space<vmem>>, vector<8x64xf32>,
    return
  }
  func.func @transform_0(%arg0: i32) -> (i32, i32) {
    %c0_i32 = arith.constant 0 : i32
    %c0_i32_0 = arith.constant 0 : i32
    return %arg0, %c0_i32 : i32, i32
  }
  func.func @transform_1(%arg0: i32) -> (i32, i32) {
    %c0_i32 = arith.constant 0 : i32
    %c0_i32_0 = arith.constant 0 : i32
    return %arg0, %c0_i32 : i32, i32
  }
  func.func @transform_2(%arg0: i32) -> (i32, i32) {
    %c0_i32 = arith.constant 0 : i32
    %c0_i32_0 = arith.constant 0 : i32
    %c0_i32_1 = arith.constant 0 : i32
    return %c0_i32, %c0_i32_0 : i32, i32
  }
  func.func @transform_3(%arg0: i32) -> (i32, i32) {
    %c0_i32 = arith.constant 0 : i32
    %c0_i32_0 = arith.constant 0 : i32
    %c0_i32_1 = arith.constant 0 : i32
    return %c0_i32, %c0_i32_0 : i32, i32
  }
  func.func @transform_4(%arg0: i32) -> (i32, i32) {
    %c0_i32 = arith.constant 0 : i32
    %c0_i32_0 = arith.constant 0 : i32
    %c0_i32_1 = arith.constant 0 : i32
    return %c0_i32, %c0_i32_0 : i32, i32
  }
  func.func @transform_5(%arg0: i32) -> (i32, i32) {
    %c0_i32 = arith.constant 0 : i32
    %c0_i32_0 = arith.constant 0 : i32
    %c0_i32_1 = arith.constant 0 : i32
    return %c0_i32, %c0_i32_0 : i32, i32
  }
  func.func @transform_6(%arg0: i32) -> (i32, i32) {
    %c0_i32 = arith.constant 0 : i32
    %c0_i32_0 = arith.constant 0 : i32
    %c0_i32_1 = arith.constant 0 : i32
    return %c0_i32, %c0_i32_0 : i32, i32
  }
  func.func @transform_7(%arg0: i32) -> (i32, i32) {
    %c0_i32 = arith.constant 0 : i32
    %c0_i32_0 = arith.constant 0 : i32
    %c0_i32_1 = arith.constant 0 : i32
    return %c0_i32, %c0_i32_0 : i32, i32
  }
  func.func @transform_8(%arg0: i32) -> (i32, i32) {
    %c0_i32 = arith.constant 0 : i32
    %c0_i32_0 = arith.constant 0 : i32
    %c0_i32_1 = arith.constant 0 : i32
    return %c0_i32, %c0_i32_0 : i32, i32
  }
  func.func @transform_9(%arg0: i32) -> (i32, i32) {
    %c0_i32 = arith.constant 0 : i32
    %c0_i32_0 = arith.constant 0 : i32
    %c0_i32_1 = arith.constant 0 : i32
    return %c0_i32, %c0_i32_0 : i32, i32
  }
  func.func @transform_10(%arg0: i32) -> (i32, i32) {
    %c0_i32 = arith.constant 0 : i32
    %c0_i32_0 = arith.constant 0 : i32
    %c0_i32_1 = arith.constant 0 : i32
    return %c0_i32, %c0_i32_0 : i32, i32
  }
  func.func @transform_11(%arg0: i32) -> (i32, i32) {
    %c0_i32 = arith.constant 0 : i32
    %c0_i32_0 = arith.constant 0 : i32
    %c0_i32_1 = arith.constant 0 : i32
    return %c0_i32, %c0_i32_0 : i32, i32
  }
  func.func @transform_12(%arg0: i32) -> (i32, i32) {
    %c0_i32 = arith.constant 0 : i32
    %c0_i32_0 = arith.constant 0 : i32
    %c0_i32_1 = arith.constant 0 : i32
    return %c0_i32, %c0_i32_0 : i32, i32
  }
  func.func @transform_13(%arg0: i32) -> (i32, i32) {
    %c0_i32 = arith.constant 0 : i32
    %c0_i32_0 = arith.constant 0 : i32
    %c0_i32_1 = arith.constant 0 : i32
    return %c0_i32, %c0_i32_0 : i32, i32
  }
  func.func @transform_14(%arg0: i32) -> (i32, i32) {
    %c0_i32 = arith.constant 0 : i32
    %c0_i32_0 = arith.constant 0 : i32
    %c0_i32_1 = arith.constant 0 : i32
    return %c0_i32, %c0_i32_0 : i32, i32
  }
  func.func @transform_15(%arg0: i32) -> (i32, i32) {
    %c0_i32 = arith.constant 0 : i32
    %c0_i32_0 = arith.constant 0 : i32
    %c0_i32_1 = arith.constant 0 : i32
    return %c0_i32, %c0_i32_0 : i32, i32
  }
  func.func @transform_16(%arg0: i32) -> (i32, i32) {
    %c0_i32 = arith.constant 0 : i32
    %c0_i32_0 = arith.constant 0 : i32
    %c0_i32_1 = arith.constant 0 : i32
    return %c0_i32, %c0_i32_0 : i32, i32
  }
  func.func @transform_17(%arg0: i32) -> (i32, i32) {
    %c0_i32 = arith.constant 0 : i32
    %c0_i32_0 = arith.constant 0 : i32
    %c0_i32_1 = arith.constant 0 : i32
    return %c0_i32, %c0_i32_0 : i32, i32
  }
  func.func @transform_18(%arg0: i32) -> (i32, i32) {
    %c0_i32 = arith.constant 0 : i32
    %c0_i32_0 = arith.constant 0 : i32
    %c0_i32_1 = arith.constant 0 : i32
    return %c0_i32, %c0_i32_0 : i32, i32
  }
  func.func @transform_19(%arg0: i32) -> (i32, i32) {
    %c0_i32 = arith.constant 0 : i32
    %c0_i32_0 = arith.constant 0 : i32
    return %arg0, %c0_i32 : i32, i32
  }
  func.func @transform_20(%arg0: i32) -> (i32, i32) {
    %c0_i32 = arith.constant 0 : i32
    %c0_i32_0 = arith.constant 0 : i32
    return %arg0, %c0_i32 : i32, i32
  }
}

</mosaic_0001>

<bundles_post_ra>
// kernel: tpu_custom_call.1
= control target key start
LH: loop header
LB: loop body
LE: loop exit
PB: predicated region body
PF: predicated region fallthrough
CT: control target
= control target key end

     0   :  { %s2923_s0 = inlined_call_operand.vmem [shape: bf16[8,1024], index: 0, kind: input, shape index: {}]   ;;  %s2924_s1 = inlined_call_operand.vmem [shape: f32[8,32], index: 1, kind: input, shape index: {}]   ;;  %s2925_s2 = inlined_call_operand.vmem [shape: bf16[1024,64], index: 2, kind: input, shape index: {}]   ;;  %s2926_s3 = inlined_call_operand.vmem [shape: f32[1,64], index: 3, kind: input, shape index: {}]   ;;  %s2927_s4 = inlined_call_operand.vmem [shape: bf16[32,64], index: 4, kind: input, shape index: {}]   ;;  %s2928_s5 = inlined_call_operand.vmem [shape: f32[1,64], index: 5, kind: input, shape index: {}]   ;;  %s2929_s6 = inlined_call_operand.vmem [shape: bf16[64,32], index: 6, kind: input, shape index: {}]   ;;  %s2930_s7 = inlined_call_operand.vmem [shape: f32[1,32], index: 7, kind: input, shape index: {}]   ;;  %s2931_s8 = inlined_call_operand.vmem [shape: bf16[64,32], index: 8, kind: input, shape index: {}]   ;;  %s2932_s9 = inlined_call_operand.vmem [shape: f32[1,32], index: 9, kind: input, shape index: {}]   ;;  %s2933_s10 = inlined_call_operand.vmem [shape: bf16[32,32], index: 10, kind: input, shape index: {}]   ;;  %s2934_s11 = inlined_call_operand.vmem [shape: bf16[32,32], index: 11, kind: input, shape index: {}]   ;;  %s2935_s12 = inlined_call_operand.vmem [shape: f32[1,32], index: 12, kind: input, shape index: {}]   ;;  %s2936_s13 = inlined_call_operand.vmem [shape: bf16[32,128], index: 13, kind: input, shape index: {}]   ;;  %s2937_s14 = inlined_call_operand.vmem [shape: f32[1,128], index: 14, kind: input, shape index: {}]   ;;  %s2938_s15 = inlined_call_operand.vmem [shape: bf16[64,1024], index: 15, kind: input, shape index: {}]   ;;  %s2939_s16 = inlined_call_operand.vmem [shape: f32[1,1024], index: 16, kind: input, shape index: {}]   ;;  %s2940_s17 = inlined_call_operand.vmem [shape: bf16[64,32], index: 17, kind: input, shape index: {}]   ;;  %s2941_s18 = inlined_call_operand.vmem [shape: f32[1,32], index: 18, kind: input, shape index: {}]   ;;  %s2942_s19 = inlined_call_operand.hbm [shape: bf16[8,1024], index: 19, kind: output, shape index: {0}]   ;;  %s2943_s20 = inlined_call_operand.hbm [shape: f32[8,64], index: 20, kind: output, shape index: {1}]  }
   0x1   :  { %2947 = sst [smem:[#allocation8_spill]] %s2923_s0 }
   0x2   :  { %2948 = sst [smem:[#allocation9_spill]] %s2924_s1 }
   0x3   :  { %2949 = sst [smem:[#allocation10_spill]] %s2925_s2 }
   0x4   :  { %2950 = sst [smem:[#allocation11_spill]] %s2926_s3 }
   0x5   :  { %2951 = sst [smem:[#allocation12_spill]] %s2927_s4 }
   0x6   :  { %26 = vsyncpa [#allocation3], 0  ;;  %s2952_s23 = sld [smem:[#allocation10_spill]]  ;;  %s2953_s29 = sld [smem:[#allocation8_spill]]  ;;  %vm804_vm0 = vcmask 261120   ;;  %vm2349_vm1 = vmmov 0  }
   0x7   :  { %s2954_s25 = sld [smem:[#allocation12_spill]]  ;;  %s2955_s27 = sld [smem:[#allocation9_spill]] }
   0xc   :  { %v2172_v0 = vld [vmem:[%s2952_s23 + $0x40] sm:$0xff]   ;;  %v2176_v4 = vld [vmem:[%s2952_s23 + $0x48] sm:$0xff]   ;;  %v2180_v8 = vld [vmem:[%s2952_s23 + $0x50] sm:$0xff]  }
   0xd   :  { %v2173_v1 = vld [vmem:[%s2952_s23 + $0xc0] sm:$0xff]   ;;  %1982 = vmatprep.subr.bf16.mxu0 %v2172_v0  ;;  %v2177_v5 = vld [vmem:[%s2952_s23 + $0xc8] sm:$0xff]   ;;  %v2181_v9 = vld [vmem:[%s2952_s23 + $0xd0] sm:$0xff]  }
   0xe   :  { %v2174_v2 = vld [vmem:[%s2952_s23] sm:$0xff]   ;;  %2004 = vmatprep.subr.bf16.mxu1 %v2173_v1  ;;  %v2178_v6 = vld [vmem:[%s2952_s23 + $0x8] sm:$0xff]   ;;  %v2182_v10 = vld [vmem:[%s2952_s23 + $0x10] sm:$0xff]  }
   0xf   :  { %v2175_v3 = vld [vmem:[%s2952_s23 + $0x80] sm:$0xff]   ;;  %1983 = vmatpush3.bf16.msra.mxu0 %v2174_v2  ;;  %v2179_v7 = vld [vmem:[%s2952_s23 + $0x88] sm:$0xff]   ;;  %v2183_v11 = vld [vmem:[%s2952_s23 + $0x90] sm:$0xff]  }
  0x10   :  { %2005 = vmatpush3.bf16.msra.mxu1 %v2175_v3  ;;  %1984 = vmatprep.subr.bf16.mxu0 %v2176_v4  ;;  %v2184_v12 = vld [vmem:[%s2952_s23 + $0x58] sm:$0xff]   ;;  %v2188_v16 = vld [vmem:[%s2952_s23 + $0x60] sm:$0xff]   ;;  %v2192_v20 = vld [vmem:[%s2952_s23 + $0x68] sm:$0xff]  }
  0x11   :  { %2006 = vmatprep.subr.bf16.mxu1 %v2177_v5  ;;  %v2185_v13 = vld [vmem:[%s2952_s23 + $0xd8] sm:$0xff]   ;;  %v2189_v17 = vld [vmem:[%s2952_s23 + $0xe0] sm:$0xff]   ;;  %v2193_v21 = vld [vmem:[%s2952_s23 + $0xe8] sm:$0xff]  }
  0x12   :  { %v2186_v14 = vld [vmem:[%s2952_s23 + $0x18] sm:$0xff]   ;;  %v2190_v18 = vld [vmem:[%s2952_s23 + $0x20] sm:$0xff]   ;;  %v2194_v22 = vld [vmem:[%s2952_s23 + $0x28] sm:$0xff]  }
  0x13   :  { %1985 = vmatpush3.bf16.msra.mxu0 %v2178_v6  ;;  %v2187_v15 = vld [vmem:[%s2952_s23 + $0x98] sm:$0xff]   ;;  %v2191_v19 = vld [vmem:[%s2952_s23 + $0xa0] sm:$0xff]   ;;  %v2195_v23 = vld [vmem:[%s2952_s23 + $0xa8] sm:$0xff]  }
  0x14   :  { %2007 = vmatpush3.bf16.msra.mxu1 %v2179_v7  ;;  %1986 = vmatprep.subr.bf16.mxu0 %v2180_v8  ;;  %v2196_v24 = vld [vmem:[%s2952_s23 + $0x70] sm:$0xff]   ;;  %v2200_v28 = vld [vmem:[%s2952_s23 + $0x78] sm:$0xff]   ;;  %v67_v32 = vld [vmem:[%s2953_s29] sm:$0xff] }
  0x15   :  { %2008 = vmatprep.subr.bf16.mxu1 %v2181_v9  ;;  %v2197_v25 = vld [vmem:[%s2952_s23 + $0xf0] sm:$0xff]   ;;  %v2201_v29 = vld [vmem:[%s2952_s23 + $0xf8] sm:$0xff]   ;;  %v68_v33 = vld [vmem:[%s2953_s29 + $0x8] sm:$0xff]  ;;  %v1824_v34 = vcombine.low %v67_v32, %v67_v32  ;;  %v1825_v35 = vcombine.high %v67_v32, %v67_v32 }
  0x16   :  { %v2198_v26 = vld [vmem:[%s2952_s23 + $0x30] sm:$0xff]   ;;  %v2202_v30 = vld [vmem:[%s2952_s23 + $0x38] sm:$0xff]   ;;  %v1826_v36 = vcombine.low %v68_v33, %v68_v33  ;;  %v1827_v37 = vcombine.high %v68_v33, %v68_v33  ;;  %v2208_v38 = vld [vmem:[%s2952_s23 + $0x140] sm:$0xff]  }
  0x17   :  { %1987 = vmatpush3.bf16.msra.mxu0 %v2182_v10  ;;  %v2199_v27 = vld [vmem:[%s2952_s23 + $0xb0] sm:$0xff]   ;;  %v2203_v31 = vld [vmem:[%s2952_s23 + $0xb8] sm:$0xff]   ;;  %v2209_v39 = vld [vmem:[%s2952_s23 + $0x1c0] sm:$0xff]   ;;  %651 = vmatprep.mubr.bf16.mxu0 %v1825_v35 }
  0x18   :  { %2009 = vmatpush3.bf16.msra.mxu1 %v2183_v11  ;;  %1988 = vmatprep.subr.bf16.mxu0 %v2184_v12  ;;  %v2210_v40 = vld [vmem:[%s2952_s23 + $0x100] sm:$0xff]   ;;  %v2212_v42 = vld [vmem:[%s2952_s23 + $0x148] sm:$0xff]   ;;  %v2216_v46 = vld [vmem:[%s2952_s23 + $0x150] sm:$0xff]  }
  0x19   :  { %2010 = vmatprep.subr.bf16.mxu1 %v2185_v13  ;;  %691 = vmatprep.mubr.bf16.mxu1 %v1827_v37  ;;  %v2211_v41 = vld [vmem:[%s2952_s23 + $0x180] sm:$0xff]   ;;  %v2213_v43 = vld [vmem:[%s2952_s23 + $0x1c8] sm:$0xff]   ;;  %v2217_v47 = vld [vmem:[%s2952_s23 + $0x1d0] sm:$0xff]   ;;  %v2348_v13 = vmov 0.0  }
  0x1a   :  { %v2214_v44 = vld [vmem:[%s2952_s23 + $0x108] sm:$0xff]   ;;  %v2218_v48 = vld [vmem:[%s2952_s23 + $0x110] sm:$0xff]   ;;  %v2220_v50 = vld [vmem:[%s2952_s23 + $0x158] sm:$0xff]  }
  0x1b   :  { %1989 = vmatpush3.bf16.msra.mxu0 %v2186_v14  ;;  %v2215_v45 = vld [vmem:[%s2952_s23 + $0x188] sm:$0xff]   ;;  %v2219_v49 = vld [vmem:[%s2952_s23 + $0x190] sm:$0xff]   ;;  %v2221_v51 = vld [vmem:[%s2952_s23 + $0x1d8] sm:$0xff]  }
  0x1c   :  { %2011 = vmatpush3.bf16.msra.mxu1 %v2187_v15  ;;  %1990 = vmatprep.subr.bf16.mxu0 %v2188_v16  ;;  %v2222_v52 = vld [vmem:[%s2952_s23 + $0x118] sm:$0xff]   ;;  %v2224_v54 = vld [vmem:[%s2952_s23 + $0x160] sm:$0xff]   ;;  %v2228_v58 = vld [vmem:[%s2952_s23 + $0x168] sm:$0xff]  }
  0x1d   :  { %2012 = vmatprep.subr.bf16.mxu1 %v2189_v17  ;;  %v2223_v53 = vld [vmem:[%s2952_s23 + $0x198] sm:$0xff]   ;;  %v2225_v55 = vld [vmem:[%s2952_s23 + $0x1e0] sm:$0xff]   ;;  %v2229_v59 = vld [vmem:[%s2952_s23 + $0x1e8] sm:$0xff]  }
  0x1e   :  { %v2226_v56 = vld [vmem:[%s2952_s23 + $0x120] sm:$0xff]   ;;  %v2230_v60 = vld [vmem:[%s2952_s23 + $0x128] sm:$0xff]   ;;  %v2232_v62 = vld [vmem:[%s2952_s23 + $0x170] sm:$0xff]  }
  0x1f   :  { %1991 = vmatpush3.bf16.msra.mxu0 %v2190_v18  ;;  %v2227_v57 = vld [vmem:[%s2952_s23 + $0x1a0] sm:$0xff]   ;;  %v2231_v61 = vld [vmem:[%s2952_s23 + $0x1a8] sm:$0xff]   ;;  %v2233_v63 = vld [vmem:[%s2952_s23 + $0x1f0] sm:$0xff]  }
  0x20   :  { %2013 = vmatpush3.bf16.msra.mxu1 %v2191_v19  ;;  %1992 = vmatprep.subr.bf16.mxu0 %v2192_v20  ;;  %v2234_v0 = vld [vmem:[%s2952_s23 + $0x130] sm:$0xff]   ;;  %v2236_v2 = vld [vmem:[%s2952_s23 + $0x178] sm:$0xff]   ;;  %v2244_v12 = vld [vmem:[%s2954_s25] sm:$0xff]  }
  0x21   :  { %2014 = vmatprep.subr.bf16.mxu1 %v2193_v21  ;;  %v2235_v1 = vld [vmem:[%s2952_s23 + $0x1b0] sm:$0xff]   ;;  %v2237_v3 = vld [vmem:[%s2952_s23 + $0x1f8] sm:$0xff]   ;;  %v2245_v14 = vld [vmem:[%s2954_s25 + $0x8] sm:$0xff]  }
  0x22   :  { %v2238_v4 = vld [vmem:[%s2952_s23 + $0x138] sm:$0xff]   ;;  %v69_v6 = vld [vmem:[%s2953_s29 + $0x10] sm:$0xff]  ;;  %v71_v15 = vld [vmem:[%s2955_s27] sm:$0xff] }
  0x23   :  { %1993 = vmatpush3.bf16.msra.mxu0 %v2194_v22  ;;  %v2239_v5 = vld [vmem:[%s2952_s23 + $0x1b8] sm:$0xff]   ;;  %v1828_v7 = vcombine.low %v69_v6, %v69_v6  ;;  %v1829_v8 = vcombine.high %v69_v6, %v69_v6  ;;  %v780_v16 = vpack.c.bf16 %v71_v15, %v71_v15 }
  0x24   :  { %2015 = vmatpush3.bf16.msra.mxu1 %v2195_v23  ;;  %1994 = vmatprep.subr.bf16.mxu0 %v2196_v24  ;;  %v70_v9 = vld [vmem:[%s2953_s29 + $0x18] sm:$0xff] }
  0x25   :  { %2016 = vmatprep.subr.bf16.mxu1 %v2197_v25  ;;  %v1830_v10 = vcombine.low %v70_v9, %v70_v9  ;;  %v1831_v11 = vcombine.high %v70_v9, %v70_v9 }
  0x27   :  { %1995 = vmatpush3.bf16.msra.mxu0 %v2198_v26 }
  0x28   :  { %2017 = vmatpush3.bf16.msra.mxu1 %v2199_v27  ;;  %1996 = vmatprep.subr.bf16.mxu0 %v2200_v28 }
  0x29   :  { %2018 = vmatprep.subr.bf16.mxu1 %v2201_v29 }
  0x2b   :  { %1997 = vmatpush3.bf16.msra.mxu0 %v2202_v30 }
  0x2c   :  { %2019 = vmatpush3.bf16.msra.mxu1 %v2203_v31  ;;  %2026 = vmatprep.subr.bf16.mxu0 %v2208_v38 }
  0x2d   :  { %2048 = vmatprep.subr.bf16.mxu1 %v2209_v39 }
  0x2e   :  { %652 = vmatmul.mubr.bf16.vlgmr.msra.gmra.mrb[0].mxu0 %v1824_v34 }
  0x2f   :  { %692 = vmatmul.mubr.bf16.vlgmr.msra.gmra.mrb[0].mxu1 %v1826_v36  ;;  %2027 = vmatpush3.bf16.msra.mxu0 %v2210_v40 }
  0x30   :  { %2049 = vmatpush3.bf16.msra.mxu1 %v2211_v41  ;;  %2028 = vmatprep.subr.bf16.mxu0 %v2212_v42 }
  0x31   :  { %2050 = vmatprep.subr.bf16.mxu1 %v2213_v43  ;;  %731 = vmatprep.mubr.bf16.mxu0 %v1829_v8 }
  0x32   :  { %771 = vmatprep.mubr.bf16.mxu1 %v1831_v11 }
  0x33   :  { %2029 = vmatpush3.bf16.msra.mxu0 %v2214_v44 }
  0x34   :  { %2051 = vmatpush3.bf16.msra.mxu1 %v2215_v45  ;;  %2030 = vmatprep.subr.bf16.mxu0 %v2216_v46 }
  0x35   :  { %2052 = vmatprep.subr.bf16.mxu1 %v2217_v47 }
  0x37   :  { %2031 = vmatpush3.bf16.msra.mxu0 %v2218_v48 }
  0x38   :  { %2053 = vmatpush3.bf16.msra.mxu1 %v2219_v49  ;;  %2032 = vmatprep.subr.bf16.mxu0 %v2220_v50 }
  0x39   :  { %2054 = vmatprep.subr.bf16.mxu1 %v2221_v51 }
  0x3b   :  { %2033 = vmatpush3.bf16.msra.mxu0 %v2222_v52 }
  0x3c   :  { %2055 = vmatpush3.bf16.msra.mxu1 %v2223_v53  ;;  %2034 = vmatprep.subr.bf16.mxu0 %v2224_v54 }
  0x3d   :  { %2056 = vmatprep.subr.bf16.mxu1 %v2225_v55 }
  0x3f   :  { %2035 = vmatpush3.bf16.msra.mxu0 %v2226_v56 }
  0x40   :  { %2057 = vmatpush3.bf16.msra.mxu1 %v2227_v57  ;;  %2036 = vmatprep.subr.bf16.mxu0 %v2228_v58 }
  0x41   :  { %2058 = vmatprep.subr.bf16.mxu1 %v2229_v59 }
  0x43   :  { %2037 = vmatpush3.bf16.msra.mxu0 %v2230_v60 }
  0x44   :  { %2059 = vmatpush3.bf16.msra.mxu1 %v2231_v61  ;;  %2038 = vmatprep.subr.bf16.mxu0 %v2232_v62 }
  0x45   :  { %2060 = vmatprep.subr.bf16.mxu1 %v2233_v63 }
  0x47   :  { %2039 = vmatpush3.bf16.msra.mxu0 %v2234_v0 }
  0x48   :  { %2061 = vmatpush3.bf16.msra.mxu1 %v2235_v1  ;;  %2040 = vmatprep.subr.bf16.mxu0 %v2236_v2 }
  0x49   :  { %2062 = vmatprep.subr.bf16.mxu1 %v2237_v3 }
  0x4b   :  { %2041 = vmatpush3.bf16.msra.mxu0 %v2238_v4 }
  0x4c   :  { %2063 = vmatpush3.bf16.msra.mxu1 %v2239_v5  ;;  %2117 = vmatprep.subr.bf16.mxu0 %v2348_v13 }
  0x4d   :  { %2097 = vmatprep.subr.bf16.mxu1 %v2348_v13 }
  0x4e   :  { %732 = vmatmul.mubr.bf16.vlgmr.msra.gmra.mrb[4].mxu0 %v1828_v7 }
  0x4f   :  { %772 = vmatmul.mubr.bf16.vlgmr.msra.gmra.mrb[4].mxu1 %v1830_v10  ;;  %2125 = vmatprep.mubr.msk.bf16.mxu0 %vm2349_vm1, %v2348_v13 }
  0x50   :  { %2098 = vmatpush3.bf16.msra.mxu1 %v2244_v12  ;;  %2101 = vmatprep.mubr.msk.bf16.mxu1 %vm2349_vm1, %v2348_v13 }
  0x51   :  { %2099 = vmatprep.subr.bf16.mxu1 %v2348_v13 }
  0x54   :  { %2100 = vmatpush3.bf16.msra.mxu1 %v2245_v14 }
  0x55   :  { %2105 = vmatprep.subr.bf16.mxu1 %v2348_v13 }
  0x57   :  { %2102 = vmatmul.mubr.msk.bf16.vlgmr.msra.gmra.mrb[8].mxu1 %vm804_vm0, %v780_v16 }
  0x58   :  { %2113 = vmatprep.mubr.msk.bf16.mxu1 %vm2349_vm1, %v2348_v13 }
  0x59   :  { %27 = vsyncpa [#allocation5], 0  ;;  %v2246_v17 = vld [vmem:[%s2929_s6] sm:$0xff]   ;;  %v2248_v19 = vld [vmem:[%s2929_s6 + $0x8] sm:$0xff]   ;;  %s2956_s0 = sld [smem:[#allocation11_spill]]  ;;  %vm889_vm2 = vcmask 523264  }
  0x5a   :  { %2106 = vmatpush3.bf16.msra.mxu1 %v2246_v17  ;;  %v2247_v18 = vld [vmem:[%s2931_s8] sm:$0xff]   ;;  %v2249_v20 = vld [vmem:[%s2931_s8 + $0x8] sm:$0xff]   ;;  %v2250_v21 = vld [vmem:[%s2929_s6 + $0x10] sm:$0xff]   ;;  %s2351_s1 = smov 64  }
  0x5b   :  { %2107 = vmatprep.subr.bf16.mxu1 %v2348_v13  ;;  %2118 = vmatpush3.bf16.msra.mxu0 %v2247_v18  ;;  %v2251_v22 = vld [vmem:[%s2931_s8 + $0x10] sm:$0xff]   ;;  %v2252_v23 = vld [vmem:[%s2929_s6 + $0x18] sm:$0xff]   ;;  %v1896_v50 = vld [vmem:[%s2928_s5] ss:$0 sm:$0xff]  ;;  %s2352_s6 = smov [#allocation2]  }
  0x5c   :  { %2119 = vmatprep.subr.bf16.mxu0 %v2348_v13  ;;  %v2253_v24 = vld [vmem:[%s2931_s8 + $0x18] sm:$0xff]   ;;  %v2254_v59 = vld [vmem:[%s2933_s10] sm:$0xff]   ;;  %v2256_v62 = vld [vmem:[%s2933_s10 + $0x8] sm:$0xff]   ;;  %s1801_s8 = sshll.u32 %s2352_s6, 4  ;;  %s1802_s8 = int_to_ptr.vmem [resolvable:$true] %s1801_s8 }
  0x5d   :  { %v2255_v61 = vld [vmem:[%s2934_s11] sm:$0xff]   ;;  %v2257_v63 = vld [vmem:[%s2934_s11 + $0x8] sm:$0xff]   ;;  %s2300_s21 = scalar_lea.vmem %s1802_s8, 512  ;;  %p2305_p1 = scmp.lt.s32.totalorder %s1802_s8, %s1802_s8 }
  0x5e   :  { %2108 = vmatpush3.bf16.msra.mxu1 %v2248_v19  ;;  %v1900_v0 = vld [vmem:[%s2930_s7] ss:$0 sm:$0xff]  ;;  %v2259_v16 = vld [vmem:[%s2936_s13 + $0x8] sm:$0xff]   ;;  %p2301_p0 = scmp.ne.s32.totalorder %s1802_s8, %s2300_s21  ;;  %p2306_p2 = scmp.lt.s32.totalorder %s2300_s21, %s2300_s21 }
  0x5f   :  { %2109 = vmatprep.subr.bf16.mxu1 %v2348_v13  ;;  %2120 = vmatpush3.bf16.msra.mxu0 %v2249_v20  ;;  %v1823_v27 = vld [vmem:[%s2956_s0] ss:$0 sm:$0xff]  ;;  %v1214_v19 = vld [vmem:[%s2938_s15 + $0x8] sm:$0xff] }
  0x60   :  { %2121 = vmatprep.subr.bf16.mxu0 %v2348_v13  ;;  %v1906_v4 = vld [vmem:[%s2932_s9] ss:$0 sm:$0xff]  ;;  %p2307_p3 = por %p2306_p2, %p2305_p1 }
  0x61   :  { %v2258_v15 = vld [vmem:[%s2936_s13] sm:$0xff]  }
  0x62   :  { %2110 = vmatpush3.bf16.msra.mxu1 %v2250_v21  ;;  %v1213_v17 = vld [vmem:[%s2938_s15] sm:$0xff]  ;;  %p2308_p4 = pnand %p2307_p3, %p2301_p0 }
  0x63   :  { %2111 = vmatprep.subr.bf16.mxu1 %v2348_v13  ;;  %2122 = vmatpush3.bf16.msra.mxu0 %v2251_v22  ;;  %v1217_v18 = vld [vmem:[%s2938_s15 + $0x20] sm:$0xff]  ;;  %v1218_v22 = vld [vmem:[%s2938_s15 + $0x28] sm:$0xff] }
  0x64   :  { %2123 = vmatprep.subr.bf16.mxu0 %v2348_v13  ;;  %v1923_v20 = vcombine.low %v1213_v17, %v1217_v18  ;;  %v1924_v21 = vcombine.high %v1213_v17, %v1217_v18  ;;  %v1228_v17 = vld [vmem:[%s2938_s15 + $0x78] sm:$0xff] }
  0x66   :  { %2112 = vmatpush3.bf16.msra.mxu1 %v2252_v23  ;;  %v1221_v23 = vld [vmem:[%s2938_s15 + $0x40] sm:$0xff] }
  0x67   :  { %2129 = vmatprep.subr.bf16.mxu1 %v2348_v13  ;;  %2124 = vmatpush3.bf16.msra.mxu0 %v2253_v24  ;;  %v1225_v24 = vld [vmem:[%s2938_s15 + $0x60] sm:$0xff] }
  0x68   :  { %2137 = vmatprep.subr.bf16.mxu0 %v2348_v13 }
 0x101   :  { %v1998_v25 = vpop.f32.mrb[0].mxu0 }
 0x102   :  { %v2020_v26 = vpop.f32.mrb[0].mxu1  ;;  %v1999_v28 = vpop.f32.mrb[1].mxu0 }
 0x103   :  { %v2021_v29 = vpop.f32.mrb[1].mxu1  ;;  %v2000_v30 = vadd.f32 %v1999_v28, %v1998_v25  ;;  %v2001_v33 = vpop.f32.mrb[2].mxu0  ;;  %v1925_v25 = vcombine.low %v1214_v19, %v1218_v22  ;;  %v1931_v28 = vcombine.low %v1221_v23, %v1225_v24 }
 0x104   :  { %v2022_v31 = vadd.f32 %v2021_v29, %v2020_v26  ;;  %v2023_v32 = vpop.f32.mrb[2].mxu1  ;;  %v2002_v35 = vpop.f32.mrb[3].mxu0  ;;  %v1926_v26 = vcombine.high %v1214_v19, %v1218_v22  ;;  %v1229_v29 = vld [vmem:[%s2938_s15 + $0x80] sm:$0xff]  ;;  %v1235_v22 = vld [vmem:[%s2938_s15 + $0xb0] sm:$0xff] }
 0x105   :  { %v2024_v34 = vpop.f32.mrb[3].mxu1  ;;  %v654_v36 = vadd.f32 %v2000_v30, %v1823_v27  ;;  %v1932_v27 = vcombine.high %v1221_v23, %v1225_v24  ;;  %v1233_v30 = vld [vmem:[%s2938_s15 + $0xa0] sm:$0xff]  ;;  %v1232_v23 = vld [vmem:[%s2938_s15 + $0x98] sm:$0xff] }
 0x106   :  { %v1939_v32 = vcombine.low %v1229_v29, %v1233_v30  ;;  %v1236_v24 = vld [vmem:[%s2938_s15 + $0xb8] sm:$0xff] }
 0x107   :  { %v694_v37 = vadd.f32 %v2022_v31, %v654_v36  ;;  %v1940_v31 = vcombine.high %v1229_v29, %v1233_v30  ;;  %v1239_v29 = vld [vmem:[%s2938_s15 + $0xd0] sm:$0xff] }
 0x108   :  { %v1243_v30 = vld [vmem:[%s2938_s15 + $0xf0] sm:$0xff] }
 0x121   :  { %v2042_v38 = vpop.f32.mrb[4].mxu0 }
 0x122   :  { %v2064_v39 = vpop.f32.mrb[4].mxu1  ;;  %v2043_v40 = vpop.f32.mrb[5].mxu0 }
 0x123   :  { %v2065_v41 = vpop.f32.mrb[5].mxu1  ;;  %v2044_v42 = vadd.f32 %v2043_v40, %v2042_v38  ;;  %v2045_v45 = vpop.f32.mrb[6].mxu0 }
 0x124   :  { %v2066_v43 = vadd.f32 %v2065_v41, %v2064_v39  ;;  %v2067_v44 = vpop.f32.mrb[6].mxu1  ;;  %v2046_v47 = vpop.f32.mrb[7].mxu0 }
 0x125   :  { %v2068_v46 = vpop.f32.mrb[7].mxu1  ;;  %v734_v48 = vadd.f32 %v2044_v42, %v694_v37  ;;  %v1918_v37 = vld [vmem:[%s2935_s12] ss:$0 sm:$0xff]  ;;  %v1222_v42 = vld [vmem:[%s2938_s15 + $0x48] sm:$0xff] }
 0x127   :  { %v774_v49 = vadd.f32 %v2066_v43, %v734_v48  ;;  %v1226_v43 = vld [vmem:[%s2938_s15 + $0x68] sm:$0xff] }
 0x128   :  { %v1934_v47 = vcombine.high %v1222_v42, %v1226_v43  ;;  %v1230_v48 = vld [vmem:[%s2938_s15 + $0x88] sm:$0xff] }
 0x129   :  { %v779_v51 = vmax.f32 %v774_v49, 0.0  ;;  %v1234_v49 = vld [vmem:[%s2938_s15 + $0xa8] sm:$0xff] }
 0x12a   :  { %v842_v52 = vpop.f32.mrb[8].mxu1 }
 0x12b   :  { %v843_v53 = vadd.f32 %v1896_v50, %v842_v52  ;;  %v2103_v54 = vpop.f32.mrb[9].mxu1  ;;  %v849_v55 = vpack.c.bf16 %v779_v51, %v779_v51  ;;  %v1933_v50 = vcombine.low %v1222_v42, %v1226_v43  ;;  %v1942_v51 = vcombine.high %v1230_v48, %v1234_v49  ;;  %v2263_v42 = vld [vmem:[%s2940_s17 + $0x18] sm:$0xff]  }
 0x12c   :  { %v845_v56 = vpop.f32.mrb[10].mxu1  ;;  %v1941_v52 = vcombine.low %v1230_v48, %v1234_v49  ;;  %v1241_v54 = vld [vmem:[%s2938_s15 + $0xe0] sm:$0xff] }
 0x12d   :  { %v848_v57 = vmax.f32 %v843_v53, 0.0  ;;  %v2104_v58 = vpop.f32.mrb[11].mxu1  ;;  %2114 = vmatmul.mubr.msk.bf16.vlgmr.msra.gmra.mrb[12].mxu1 %vm889_vm2, %v849_v55  ;;  %v1237_v53 = vld [vmem:[%s2938_s15 + $0xc0] sm:$0xff]  ;;  %v1238_v55 = vld [vmem:[%s2938_s15 + $0xc8] sm:$0xff] }
 0x12e   :  { %2133 = vmatprep.mubr.msk.bf16.mxu1 %vm2349_vm1, %v2348_v13  ;;  %2130 = vmatpush3.bf16.msra.mxu1 %v2255_v61  ;;  %v1948_v56 = vcombine.high %v1237_v53, %v1241_v54  ;;  %v1947_v58 = vcombine.low %v1237_v53, %v1241_v54  ;;  %v1215_v61 = vld [vmem:[%s2938_s15 + $0x10] sm:$0xff]  ;;  %v1245_v48 = vld [vmem:[%s2939_s16] sm:$0xff] }
 0x12f   :  { %v933_v60 = vpack.c.bf16 %v848_v57, %v848_v57  ;;  %2131 = vmatprep.subr.bf16.mxu1 %v2348_v13  ;;  %v1242_v57 = vld [vmem:[%s2938_s15 + $0xe8] sm:$0xff] }
 0x131   :  { %2126 = vmatmul.mubr.msk.bf16.vlgmr.msra.gmra.mrb[8].mxu0 %vm889_vm2, %v933_v60  ;;  %v1950_v60 = vcombine.high %v1238_v55, %v1242_v57 }
 0x132   :  { %2138 = vmatpush3.bf16.msra.mxu0 %v2254_v59  ;;  %2141 = vmatprep.mubr.msk.bf16.mxu0 %vm2349_vm1, %v2348_v13  ;;  %v1949_v59 = vcombine.low %v1238_v55, %v1242_v57 }
 0x133   :  { %2139 = vmatprep.subr.bf16.mxu0 %v2348_v13  ;;  %2132 = vmatpush3.bf16.msra.mxu1 %v2257_v63  ;;  %v1216_v63 = vld [vmem:[%s2938_s15 + $0x18] sm:$0xff] }
 0x134   :  { %2145 = vmatprep.subr.bf16.mxu1 %v2348_v13 }
 0x136   :  { %2140 = vmatpush3.bf16.msra.mxu0 %v2256_v62  ;;  %v1219_v62 = vld [vmem:[%s2938_s15 + $0x30] sm:$0xff] }
 0x137   :  { %1450 = vmatprep.subr.bf16.mxu0 %v1924_v21  ;;  %v1231_v21 = vld [vmem:[%s2938_s15 + $0x90] sm:$0xff] }
 0x200   :  { %v927_v1 = vpop.f32.mrb[12].mxu1 }
 0x201   :  { %v928_v2 = vadd.f32 %v1900_v0, %v927_v1  ;;  %v2115_v3 = vpop.f32.mrb[13].mxu1  ;;  %v1928_v0 = vcombine.high %v1215_v61, %v1219_v62  ;;  %v1220_v1 = vld [vmem:[%s2938_s15 + $0x38] sm:$0xff] }
 0x202   :  { %v930_v5 = vpop.f32.mrb[14].mxu1  ;;  %v1929_v3 = vcombine.low %v1216_v63, %v1220_v1 }
 0x203   :  { %v1016_v6 = vpack.c.bf16 %v928_v2, %v928_v2  ;;  %v2116_v7 = vpop.f32.mrb[15].mxu1  ;;  %v1927_v2 = vcombine.low %v1215_v61, %v1219_v62  ;;  %v2350_v5 = vmov 0  }
 0x204   :  { %v1010_v8 = vpop.f32.mrb[8].mxu0 }
 0x205   :  { %v1011_v9 = vadd.f32 %v1906_v4, %v1010_v8  ;;  %v2127_v10 = vpop.f32.mrb[9].mxu0  ;;  %2142 = vmatmul.mubr.msk.bf16.vlgmr.msra.gmra.mrb[12].mxu0 %vm804_vm0, %v1016_v6  ;;  %v1930_v4 = vcombine.high %v1216_v63, %v1220_v1  ;;  %v1919_v6 = vld [vmem:[%s2937_s14] ss:$0 sm:$0xff] }
 0x206   :  { %v1013_v11 = vpop.f32.mrb[10].mxu0  ;;  %1451 = vmatpush1.bf16.msra.mxu0 %v1923_v20  ;;  %1482 = vmatprep.mubr.bf16.mxu0 %v2350_v5 }
 0x207   :  { %v1021_v12 = vpack.c.bf16 %v1011_v9, %v1011_v9  ;;  %v2128_v14 = vpop.f32.mrb[11].mxu0  ;;  %1452 = vmatprep.subr.bf16.mxu0 %v1932_v27  ;;  %v1223_v11 = vld [vmem:[%s2938_s15 + $0x50] sm:$0xff]  ;;  %v1944_v27 = vcombine.high %v1231_v21, %v1235_v22 }
 0x209   :  { %2134 = vmatmul.mubr.msk.bf16.vlgmr.msra.gmra.mrb[16].mxu1 %vm804_vm0, %v1021_v12  ;;  %v1227_v12 = vld [vmem:[%s2938_s15 + $0x70] sm:$0xff] }
 0x20a   :  { %2149 = vmatprep.mubr.msk.bf16.mxu1 %vm2349_vm1, %v2348_v13  ;;  %2146 = vmatpush3.bf16.msra.mxu1 %v2258_v15  ;;  %v1936_v19 = vcombine.high %v1223_v11, %v1227_v12 }
 0x20b   :  { %2147 = vmatprep.subr.bf16.mxu1 %v2348_v13  ;;  %1453 = vmatpush1.bf16.msra.mxu0 %v1931_v28  ;;  %v1946_v28 = vcombine.high %v1232_v23, %v1236_v24 }
 0x20c   :  { %1454 = vmatprep.subr.bf16.mxu0 %v1940_v31  ;;  %v1240_v31 = vld [vmem:[%s2938_s15 + $0xd8] sm:$0xff] }
 0x20e   :  { %2148 = vmatpush3.bf16.msra.mxu1 %v2259_v16  ;;  %v1224_v16 = vld [vmem:[%s2938_s15 + $0x58] sm:$0xff] }
 0x20f   :  { %1491 = vmatprep.subr.bf16.mxu1 %v1926_v26  ;;  %1455 = vmatpush1.bf16.msra.mxu0 %v1939_v32  ;;  %v1938_v20 = vcombine.high %v1224_v16, %v1228_v17  ;;  %v1937_v26 = vcombine.low %v1224_v16, %v1228_v17  ;;  %v1244_v32 = vld [vmem:[%s2938_s15 + $0xf8] sm:$0xff] }
 0x210   :  { %1456 = vmatprep.subr.bf16.mxu0 %v1948_v56 }
 0x213   :  { %1457 = vmatpush1.bf16.msra.mxu0 %v1947_v58 }
 0x214   :  { %1532 = vmatprep.subr.bf16.mxu0 %v1928_v0 }
 0x2d8   :  { %v1130_v33 = vpop.f32.mrb[12].mxu0 }
 0x2d9   :  { %v2143_v34 = vpop.f32.mrb[13].mxu0 }
 0x2da   :  { %v1133_v35 = vpop.f32.mrb[14].mxu0  ;;  %v1945_v34 = vcombine.low %v1232_v23, %v1236_v24 }
 0x2db   :  { %v2144_v38 = vpop.f32.mrb[15].mxu0  ;;  %v1952_v35 = vcombine.high %v1239_v29, %v1243_v30 }
 0x2dc   :  { %v1075_v36 = vpop.f32.mrb[16].mxu1  ;;  %v1953_v38 = vcombine.low %v1240_v31, %v1244_v32 }
 0x2dd   :  { %v1131_v39 = vadd.f32 %v1130_v33, %v1075_v36  ;;  %v2135_v40 = vpop.f32.mrb[17].mxu1  ;;  %v1943_v33 = vcombine.low %v1231_v21, %v1235_v22  ;;  %v1954_v36 = vcombine.high %v1240_v31, %v1244_v32 }
 0x2de   :  { %v1078_v41 = vpop.f32.mrb[18].mxu1  ;;  %v2261_v40 = vld [vmem:[%s2940_s17 + $0x8] sm:$0xff]  }
 0x2df   :  { %v2793_v44 = vadd.f32 %v1918_v37, %v1131_v39  ;;  %v2136_v45 = vpop.f32.mrb[19].mxu1  ;;  %v1951_v37 = vcombine.low %v1239_v29, %v1243_v30  ;;  %v2260_v39 = vld [vmem:[%s2940_s17] sm:$0xff]   ;;  %v2262_v41 = vld [vmem:[%s2940_s17 + $0x10] sm:$0xff]  }
 0x2e0   :  { %v1247_v45 = vlaneseq }
 0x2e1   :  { %v1144_v46 = vpack.c.bf16 %v2793_v44, %v2793_v44 }
 0x2e3   :  { %2150 = vmatmul.mubr.msk.bf16.vlgmr.msra.gmra.mrb[20].mxu1 %vm804_vm0, %v1144_v46  ;;  %v1248_v46 = vshrl.u32 %v1247_v45, 7 }
 0x2e4   :  { %1492 = vmatpush1.bf16.msra.mxu1 %v1925_v25  ;;  %1523 = vmatprep.mubr.bf16.mxu1 %v2350_v5  ;;  %v1935_v25 = vcombine.low %v1223_v11, %v1227_v12 }
 0x2e5   :  { %1493 = vmatprep.subr.bf16.mxu1 %v1934_v47  ;;  %v1249_v47 = vsub.s32 0, %v1248_v46  ;;  %v1257_v49 = vsub.s32 2, %v1248_v46 }
 0x2e7   :  { %v1258_v53 = vrot.slane %v1245_v48, %v1257_v49 }
 0x2e8   :  { %1494 = vmatpush1.bf16.msra.mxu1 %v1933_v50  ;;  %v1253_v50 = vsub.s32 1, %v1248_v46 }
 0x2e9   :  { %1495 = vmatprep.subr.bf16.mxu1 %v1942_v51  ;;  %v1261_v51 = vsub.s32 3, %v1248_v46 }
 0x2ea   :  { %v1254_v54 = vrot.slane %v1245_v48, %v1253_v50 }
 0x2eb   :  { %v1262_v55 = vrot.slane %v1245_v48, %v1261_v51 }
 0x2ec   :  { %1496 = vmatpush1.bf16.msra.mxu1 %v1941_v52  ;;  %v1250_v52 = vrot.slane %v1245_v48, %v1249_v47 }
 0x2ed   :  { %1497 = vmatprep.subr.bf16.mxu1 %v1950_v60 }
 0x2f0   :  { %1498 = vmatpush1.bf16.msra.mxu1 %v1949_v59 }
 0x2f1   :  { %1573 = vmatprep.subr.bf16.mxu1 %v1930_v4 }
 0x3b6   :  { %v1205_v7 = vpop.f32.mrb[20].mxu1 }
 0x3b7   :  { %v1206_v8 = vadd.f32 %v1919_v6, %v1205_v7  ;;  %v2151_v9 = vpop.f32.mrb[21].mxu1  ;;  %v1265_v7 = vsub.s32 4, %v1248_v46 }
 0x3b8   :  { %v1208_v10 = vpop.f32.mrb[22].mxu1  ;;  %v1269_v9 = vsub.s32 5, %v1248_v46 }
 0x3b9   :  { %v1211_v14 = vmax.f32 %v1206_v8, 0.0  ;;  %v2152_v15 = vpop.f32.mrb[23].mxu1  ;;  %v1273_v8 = vsub.s32 6, %v1248_v46  ;;  %v1277_v10 = vsub.s32 7, %v1248_v46  ;;  %v1266_v11 = vrot.slane %v1245_v48, %v1265_v7 }
 0x3bb   :  { %v1212_v18 = vpack.c.bf16 %v1211_v14, %v1211_v14  ;;  %v1274_v12 = vrot.slane %v1245_v48, %v1273_v8  ;;  %v1270_v14 = vrot.slane %v1245_v48, %v1269_v9  ;;  %v1278_v16 = vrot.slane %v1245_v48, %v1277_v10 }
 0x3bd   :  { %1714 = vrot.lane.b32.xlu0 %v1212_v18, %s2351_s1  ;;  %1955 = vmatmul.mubr.msk.bf16.vlgmr.msra.gmra.mrb[16].mxu0 %vm889_vm2, %v1212_v18 }
 0x3be   :  { %1956 = vmatmul.mubr.msk.bf16.vlgmr.msra.gmra.mrb[24].mxu1 %vm889_vm2, %v1212_v18  ;;  %1533 = vmatpush1.bf16.msra.mxu0 %v1927_v2 }
 0x3bf   :  { %1574 = vmatpush1.bf16.msra.mxu1 %v1929_v3  ;;  %1534 = vmatprep.subr.bf16.mxu0 %v1936_v19 }
 0x3c0   :  { %1575 = vmatprep.subr.bf16.mxu1 %v1938_v20  ;;  %1564 = vmatprep.mubr.bf16.mxu0 %v2350_v5 }
 0x3c1   :  { %1605 = vmatprep.mubr.bf16.mxu1 %v2350_v5 }
 0x3c2   :  { %1535 = vmatpush1.bf16.msra.mxu0 %v1935_v25 }
 0x3c3   :  { %1576 = vmatpush1.bf16.msra.mxu1 %v1937_v26  ;;  %1536 = vmatprep.subr.bf16.mxu0 %v1944_v27 }
 0x3c4   :  { %1577 = vmatprep.subr.bf16.mxu1 %v1946_v28 }
 0x3c6   :  { %1537 = vmatpush1.bf16.msra.mxu0 %v1943_v33 }
 0x3c7   :  { %1578 = vmatpush1.bf16.msra.mxu1 %v1945_v34  ;;  %1538 = vmatprep.subr.bf16.mxu0 %v1952_v35 }
 0x3c8   :  { %1579 = vmatprep.subr.bf16.mxu1 %v1954_v36 }
 0x3ca   :  { %1539 = vmatpush1.bf16.msra.mxu0 %v1951_v37 }
 0x3cb   :  { %1580 = vmatpush1.bf16.msra.mxu1 %v1953_v38  ;;  %2153 = vmatprep.subr.bf16.mxu0 %v2348_v13 }
 0x3cd   :  { %1957 = vmatmul.mubr.msk.bf16.vlgmr.msra.gmra.mrb[20].mxu0 %vm889_vm2, %v1212_v18 }
 0x3ce   :  { %1958 = vmatmul.mubr.msk.bf16.vlgmr.msra.gmra.mrb[28].mxu1 %vm889_vm2, %v1212_v18  ;;  %2154 = vmatpush3.bf16.msra.mxu0 %v2260_v39 }
 0x3cf   :  { %2155 = vmatprep.subr.bf16.mxu0 %v2348_v13  ;;  %2161 = vmatprep.mubr.msk.bf16.mxu0 %vm2349_vm1, %v2348_v13 }
 0x3d2   :  { %2156 = vmatpush3.bf16.msra.mxu0 %v2261_v40 }
 0x3d3   :  { %2157 = vmatprep.subr.bf16.mxu0 %v2348_v13 }
 0x3d6   :  { %2158 = vmatpush3.bf16.msra.mxu0 %v2262_v41 }
 0x3d7   :  { %2159 = vmatprep.subr.bf16.mxu0 %v2348_v13 }
 0x3da   :  { %2160 = vmatpush3.bf16.msra.mxu0 %v2263_v42 }
 0x42f   :  { %v1715_v43 = vpop.permute.xlu0 %1714 }
 0x430   :  { %2162 = vmatmul.mubr.msk.bf16.vlgmr.msra.gmra.mrb[24].mxu0 %vm889_vm2, %v1715_v43 }
 0x490   :  { %v1484_v56 = vpop.f32.mrb[16].mxu0 }
 0x491   :  { %v1485_v13 = vadd.f32 %v1484_v56, %v1250_v52  ;;  %v1525_v57 = vpop.f32.mrb[24].mxu1  ;;  %v1486_v58 = vpop.f32.mrb[17].mxu0 }
 0x492   :  { %v1526_v59 = vadd.f32 %v1525_v57, %v1258_v53  ;;  %v1487_v60 = vadd.f32 %v1486_v58, %v1254_v54  ;;  %v1527_v61 = vpop.f32.mrb[25].mxu1  ;;  %v1488_v62 = vpop.f32.mrb[18].mxu0 }
 0x493   :  { %v1959_v63 = vmul.f32 -1.442695, %v1485_v13  ;;  %v1528_v0 = vadd.f32 %v1527_v61, %v1262_v55  ;;  %v1529_v1 = vpop.f32.mrb[26].mxu1  ;;  %v1489_v2 = vpop.f32.mrb[19].mxu0 }
 0x494   :  { %v1961_v3 = vmul.f32 -1.442695, %v1526_v59  ;;  %v1960_v4 = vmul.f32 -1.442695, %v1487_v60  ;;  %v1530_v5 = vpop.f32.mrb[27].mxu1 }
 0x495   :  { %2264 = vpow2.f32 %v1959_v63  ;;  %v1962_v6 = vmul.f32 -1.442695, %v1528_v0  ;;  %v1971_v60 = vld [vmem:[%s2941_s18] ss:$0 sm:$0xff] }
 0x496   :  { %2266 = vpow2.f32 %v1961_v3 }
 0x497   :  { %2268 = vpow2.f32 %v1960_v4 }
 0x498   :  { %2270 = vpow2.f32 %v1962_v6 }
 0x49f   :  { %v2265_v15 = vpop.eup %2264 }
 0x4a0   :  { %v2267_v17 = vpop.eup %2266  ;;  %v1638_v18 = vadd.f32 1.0, %v2265_v15  ;;  %v1566_v19 = vpop.f32.mrb[20].mxu0 }
 0x4a1   :  { %v2269_v20 = vpop.eup %2268  ;;  %v1640_v21 = vadd.f32 1.0, %v2267_v17  ;;  %v1567_v22 = vadd.f32 %v1566_v19, %v1266_v11  ;;  %v1607_v23 = vpop.f32.mrb[28].mxu1 }
 0x4a2   :  { %v1568_v24 = vpop.f32.mrb[21].mxu0  ;;  %v2271_v25 = vpop.eup %2270  ;;  %2272 = vrcp.f32 %v1638_v18  ;;  %v1639_v26 = vadd.f32 1.0, %v2269_v20  ;;  %v1608_v27 = vadd.f32 %v1607_v23, %v1274_v12 }
 0x4a3   :  { %v1569_v28 = vadd.f32 %v1568_v24, %v1270_v14  ;;  %v1609_v29 = vpop.f32.mrb[29].mxu1  ;;  %v1570_v30 = vpop.f32.mrb[22].mxu0  ;;  %2274 = vrcp.f32 %v1640_v21  ;;  %v1641_v31 = vadd.f32 1.0, %v2271_v25  ;;  %v1963_v32 = vmul.f32 -1.442695, %v1567_v22 }
 0x4a4   :  { %v1610_v33 = vadd.f32 %v1609_v29, %v1278_v16  ;;  %v1611_v34 = vpop.f32.mrb[30].mxu1  ;;  %v1571_v35 = vpop.f32.mrb[23].mxu0  ;;  %2276 = vrcp.f32 %v1639_v26  ;;  %v1965_v36 = vmul.f32 -1.442695, %v1608_v27 }
 0x4a5   :  { %v1964_v37 = vmul.f32 -1.442695, %v1569_v28  ;;  %v1612_v38 = vpop.f32.mrb[31].mxu1  ;;  %2278 = vrcp.f32 %v1641_v31 }
 0x4a6   :  { %v1966_v39 = vmul.f32 -1.442695, %v1610_v33  ;;  %2280 = vpow2.f32 %v1963_v32 }
 0x4a7   :  { %2282 = vpow2.f32 %v1965_v36 }
 0x4a8   :  { %2284 = vpow2.f32 %v1964_v37 }
 0x4a9   :  { %2286 = vpow2.f32 %v1966_v39 }
 0x4ac   :  { %v2273_v40 = vpop.eup %2272 }
 0x4ad   :  { %v2275_v41 = vpop.eup %2274 }
 0x4ae   :  { %v2277_v42 = vpop.eup %2276 }
 0x4af   :  { %v2279_v43 = vpop.eup %2278  ;;  %v1978_v45 = vpack.c.bf16 %v2277_v42, %v2273_v40 }
 0x4b0   :  { %v2281_v46 = vpop.eup %2280  ;;  %v1979_v47 = vpack.c.bf16 %v2279_v43, %v2275_v41 }
 0x4b1   :  { %v2283_v48 = vpop.eup %2282  ;;  %v1642_v49 = vadd.f32 1.0, %v2281_v46  ;;  %1694 = vst [vmem:[#allocation2] sm:$0xff] %v1978_v45 }
 0x4b2   :  { %v2285_v50 = vpop.eup %2284  ;;  %v1644_v51 = vadd.f32 1.0, %v2283_v48  ;;  %1695 = vst [vmem:[#allocation2 + $0x8] sm:$0xff] %v1979_v47 }
 0x4b3   :  { %v2287_v52 = vpop.eup %2286  ;;  %2288 = vrcp.f32 %v1642_v49  ;;  %v1643_v53 = vadd.f32 1.0, %v2285_v50 }
 0x4b4   :  { %2290 = vrcp.f32 %v1644_v51  ;;  %v1645_v54 = vadd.f32 1.0, %v2287_v52 }
 0x4b5   :  { %2292 = vrcp.f32 %v1643_v53 }
 0x4b6   :  { %2294 = vrcp.f32 %v1645_v54 }
 0x4bd   :  { %v2289_v55 = vpop.eup %2288 }
 0x4be   :  { %v2291_v56 = vpop.eup %2290 }
 0x4bf   :  { %v2293_v13 = vpop.eup %2292 }
 0x4c0   :  { %v2295_v57 = vpop.eup %2294  ;;  %v1980_v58 = vpack.c.bf16 %v2293_v13, %v2289_v55 }
 0x4c1   :  { %v1981_v59 = vpack.c.bf16 %v2295_v57, %v2291_v56 }
 0x4c2   :  { %1696 = vst [vmem:[#allocation2 + $0x10] sm:$0xff] %v1980_v58 }
 0x4c3   :  { %1697 = vst [vmem:[#allocation2 + $0x18] sm:$0xff] %v1981_v59 }
 0x503   :  { %v1777_v61 = vpop.f32.mrb[24].mxu0 }
 0x504   :  { %v1778_v62 = vadd.f32 %v1971_v60, %v1777_v61  ;;  %v2163_v63 = vpop.f32.mrb[25].mxu0 }
 0x505   :  { %v1780_v0 = vpop.f32.mrb[26].mxu0 }
 0x506   :  { %v1977_v1 = vmul.f32 -1.442695, %v1778_v62  ;;  %v2164_v2 = vpop.f32.mrb[27].mxu0 }
 0x508   :  { %2296 = vpow2.f32 %v1977_v1 }
 0x512   :  { %v2297_v3 = vpop.eup %2296 }
 0x513   :  { %v1786_v4 = vadd.f32 1.0, %v2297_v3 }
 0x515   :  { %2298 = vrcp.f32 %v1786_v4 }
 0x516   :  { %2311 = shalt.err (!%p2308_p4)
}
 0x517   :  { %s2312_s13 = scalar_lea.hbm %s2942_s19, 512 }
 0x518   :  { %p2313_p5 = scmp.ne.s32.totalorder %s2942_s19, %s2312_s13  ;;  %p2316_p6 = scmp.lt.u32.totalorder %s2312_s13, %s2942_s19 }
 0x51a   :  { %p2318_p7 = pnand %p2316_p6, %p2313_p5 }
 0x51c   :  { %2321 = shalt.err (!%p2318_p7)
}
 0x51d   :  { %1804 = dma.vmem_to_hbm [thread:$0]  %s1802_s8, 512, %s2942_s19, [#allocation3]  }
 0x51e   :  { %s2353_s3 = smov 32   ;;  %s2354_s26 = smov [#allocation4]  }
 0x51f   :  { %v2299_v5 = vpop.eup %2298  ;;  %s1811_s29 = sshll.u32 %s2354_s26, 4  ;;  %s1812_s29 = int_to_ptr.vmem [resolvable:$true] %s1811_s29 }
 0x520   :  { %1790 = vrot.lane.b32.xlu0 %v2299_v5, %s2353_s3  ;;  %s2322_s10 = scalar_lea.vmem %s1812_s29, 128  ;;  %p2327_p9 = scmp.lt.s32.totalorder %s1812_s29, %s1812_s29 }
 0x521   :  { %p2323_p8 = scmp.ne.s32.totalorder %s1812_s29, %s2322_s10  ;;  %p2328_p10 = scmp.lt.s32.totalorder %s2322_s10, %s2322_s10 }
 0x523   :  { %p2329_p11 = por %p2328_p10, %p2327_p9 }
 0x525   :  { %p2330_p12 = pnand %p2329_p11, %p2323_p8 }
 0x592   :  { %v1791_v6 = vpop.permute.xlu0 %1790 }
 0x593   :  { %v1793_v7 = vsel %vm804_vm0, %v2793_v44, %v1791_v6 }
 0x594   :  { %1794 = vst.msk [vmem:[#allocation4] sm:$0xff] %vm889_vm2, %v1793_v7 }
 0x595   :  { %2333 = shalt.err (!%p2330_p12)
}
 0x596   :  { %s2334_s11 = scalar_lea.hbm %s2943_s20, 128 }
 0x597   :  { %p2335_p13 = scmp.ne.s32.totalorder %s2943_s20, %s2334_s11  ;;  %p2338_p0 = scmp.lt.u32.totalorder %s2334_s11, %s2943_s20 }
 0x599   :  { %p2340_p1 = pnand %p2338_p0, %p2335_p13 }
 0x59b   :  { %2343 = shalt.err (!%p2340_p1)
}
 0x59c   :  { %1814 = dma.vmem_to_hbm [thread:$0]  %s1812_s29, 128, %s2943_s20, [#allocation5]  }
 0x59d   :  { %2344 = dma.done.wait [#allocation3], 512  }
 0x59e   :  { %2345 = vsyncadd [#allocation3], 4294966784 }
 0x59f   :  { %2346 = dma.done.wait [#allocation5], 128  }
 0x5a0   :  { %2347 = vsyncadd [#allocation5], 4294967168 }
 0x5a1   :  { %1821 = vsyncpa [#allocation3], 1 }
 0x5a2   :  { %1822 = vsyncpa [#allocation5], 1 }

// kernel: tpu_custom_call.1
= control target key start
LH: loop header
LB: loop body
LE: loop exit
PB: predicated region body
PF: predicated region fallthrough
CT: control target
= control target key end

     0   :  { %s2923_s0 = inlined_call_operand.vmem [shape: bf16[8,1024], index: 0, kind: input, shape index: {}]   ;;  %s2924_s1 = inlined_call_operand.vmem [shape: f32[8,32], index: 1, kind: input, shape index: {}]   ;;  %s2925_s2 = inlined_call_operand.vmem [shape: bf16[1024,64], index: 2, kind: input, shape index: {}]   ;;  %s2926_s3 = inlined_call_operand.vmem [shape: f32[1,64], index: 3, kind: input, shape index: {}]   ;;  %s2927_s4 = inlined_call_operand.vmem [shape: bf16[32,64], index: 4, kind: input, shape index: {}]   ;;  %s2928_s5 = inlined_call_operand.vmem [shape: f32[1,64], index: 5, kind: input, shape index: {}]   ;;  %s2929_s6 = inlined_call_operand.vmem [shape: bf16[64,32], index: 6, kind: input, shape index: {}]   ;;  %s2930_s7 = inlined_call_operand.vmem [shape: f32[1,32], index: 7, kind: input, shape index: {}]   ;;  %s2931_s8 = inlined_call_operand.vmem [shape: bf16[64,32], index: 8, kind: input, shape index: {}]   ;;  %s2932_s9 = inlined_call_operand.vmem [shape: f32[1,32], index: 9, kind: input, shape index: {}]   ;;  %s2933_s10 = inlined_call_operand.vmem [shape: bf16[32,32], index: 10, kind: input, shape index: {}]   ;;  %s2934_s11 = inlined_call_operand.vmem [shape: bf16[32,32], index: 11, kind: input, shape index: {}]   ;;  %s2935_s12 = inlined_call_operand.vmem [shape: f32[1,32], index: 12, kind: input, shape index: {}]   ;;  %s2936_s13 = inlined_call_operand.vmem [shape: bf16[32,128], index: 13, kind: input, shape index: {}]   ;;  %s2937_s14 = inlined_call_operand.vmem [shape: f32[1,128], index: 14, kind: input, shape index: {}]   ;;  %s2938_s15 = inlined_call_operand.vmem [shape: bf16[64,1024], index: 15, kind: input, shape index: {}]   ;;  %s2939_s16 = inlined_call_operand.vmem [shape: f32[1,1024], index: 16, kind: input, shape index: {}]   ;;  %s2940_s17 = inlined_call_operand.vmem [shape: bf16[64,32], index: 17, kind: input, shape index: {}]   ;;  %s2941_s18 = inlined_call_operand.vmem [shape: f32[1,32], index: 18, kind: input, shape index: {}]   ;;  %s2942_s19 = inlined_call_operand.hbm [shape: bf16[8,1024], index: 19, kind: output, shape index: {0}]   ;;  %s2943_s20 = inlined_call_operand.hbm [shape: f32[8,64], index: 20, kind: output, shape index: {1}]  }
   0x1   :  { %2947 = sst [smem:[#allocation8_spill]] %s2923_s0 }
   0x2   :  { %2948 = sst [smem:[#allocation9_spill]] %s2924_s1 }
   0x3   :  { %2949 = sst [smem:[#allocation10_spill]] %s2925_s2 }
   0x4   :  { %2950 = sst [smem:[#allocation11_spill]] %s2926_s3 }
   0x5   :  { %2951 = sst [smem:[#allocation12_spill]] %s2927_s4 }
   0x6   :  { %26 = vsyncpa [#allocation3], 0  ;;  %s2952_s23 = sld [smem:[#allocation10_spill]]  ;;  %s2953_s29 = sld [smem:[#allocation8_spill]]  ;;  %vm804_vm0 = vcmask 261120   ;;  %vm2349_vm1 = vmmov 0  }
   0x7   :  { %s2954_s25 = sld [smem:[#allocation12_spill]]  ;;  %s2955_s27 = sld [smem:[#allocation9_spill]] }
   0xc   :  { %v2172_v0 = vld [vmem:[%s2952_s23 + $0x40] sm:$0xff]   ;;  %v2176_v4 = vld [vmem:[%s2952_s23 + $0x48] sm:$0xff]   ;;  %v2180_v8 = vld [vmem:[%s2952_s23 + $0x50] sm:$0xff]  }
   0xd   :  { %v2173_v1 = vld [vmem:[%s2952_s23 + $0xc0] sm:$0xff]   ;;  %1982 = vmatprep.subr.bf16.mxu0 %v2172_v0  ;;  %v2177_v5 = vld [vmem:[%s2952_s23 + $0xc8] sm:$0xff]   ;;  %v2181_v9 = vld [vmem:[%s2952_s23 + $0xd0] sm:$0xff]  }
   0xe   :  { %v2174_v2 = vld [vmem:[%s2952_s23] sm:$0xff]   ;;  %2004 = vmatprep.subr.bf16.mxu1 %v2173_v1  ;;  %v2178_v6 = vld [vmem:[%s2952_s23 + $0x8] sm:$0xff]   ;;  %v2182_v10 = vld [vmem:[%s2952_s23 + $0x10] sm:$0xff]  }
   0xf   :  { %v2175_v3 = vld [vmem:[%s2952_s23 + $0x80] sm:$0xff]   ;;  %1983 = vmatpush3.bf16.msra.mxu0 %v2174_v2  ;;  %v2179_v7 = vld [vmem:[%s2952_s23 + $0x88] sm:$0xff]   ;;  %v2183_v11 = vld [vmem:[%s2952_s23 + $0x90] sm:$0xff]  }
  0x10   :  { %2005 = vmatpush3.bf16.msra.mxu1 %v2175_v3  ;;  %1984 = vmatprep.subr.bf16.mxu0 %v2176_v4  ;;  %v2184_v12 = vld [vmem:[%s2952_s23 + $0x58] sm:$0xff]   ;;  %v2188_v16 = vld [vmem:[%s2952_s23 + $0x60] sm:$0xff]   ;;  %v2192_v20 = vld [vmem:[%s2952_s23 + $0x68] sm:$0xff]  }
  0x11   :  { %2006 = vmatprep.subr.bf16.mxu1 %v2177_v5  ;;  %v2185_v13 = vld [vmem:[%s2952_s23 + $0xd8] sm:$0xff]   ;;  %v2189_v17 = vld [vmem:[%s2952_s23 + $0xe0] sm:$0xff]   ;;  %v2193_v21 = vld [vmem:[%s2952_s23 + $0xe8] sm:$0xff]  }
  0x12   :  { %v2186_v14 = vld [vmem:[%s2952_s23 + $0x18] sm:$0xff]   ;;  %v2190_v18 = vld [vmem:[%s2952_s23 + $0x20] sm:$0xff]   ;;  %v2194_v22 = vld [vmem:[%s2952_s23 + $0x28] sm:$0xff]  }
  0x13   :  { %1985 = vmatpush3.bf16.msra.mxu0 %v2178_v6  ;;  %v2187_v15 = vld [vmem:[%s2952_s23 + $0x98] sm:$0xff]   ;;  %v2191_v19 = vld [vmem:[%s2952_s23 + $0xa0] sm:$0xff]   ;;  %v2195_v23 = vld [vmem:[%s2952_s23 + $0xa8] sm:$0xff]  }
  0x14   :  { %2007 = vmatpush3.bf16.msra.mxu1 %v2179_v7  ;;  %1986 = vmatprep.subr.bf16.mxu0 %v2180_v8  ;;  %v2196_v24 = vld [vmem:[%s2952_s23 + $0x70] sm:$0xff]   ;;  %v2200_v28 = vld [vmem:[%s2952_s23 + $0x78] sm:$0xff]   ;;  %v67_v32 = vld [vmem:[%s2953_s29] sm:$0xff] }
  0x15   :  { %2008 = vmatprep.subr.bf16.mxu1 %v2181_v9  ;;  %v2197_v25 = vld [vmem:[%s2952_s23 + $0xf0] sm:$0xff]   ;;  %v2201_v29 = vld [vmem:[%s2952_s23 + $0xf8] sm:$0xff]   ;;  %v68_v33 = vld [vmem:[%s2953_s29 + $0x8] sm:$0xff]  ;;  %v1824_v34 = vcombine.low %v67_v32, %v67_v32  ;;  %v1825_v35 = vcombine.high %v67_v32, %v67_v32 }
  0x16   :  { %v2198_v26 = vld [vmem:[%s2952_s23 + $0x30] sm:$0xff]   ;;  %v2202_v30 = vld [vmem:[%s2952_s23 + $0x38] sm:$0xff]   ;;  %v1826_v36 = vcombine.low %v68_v33, %v68_v33  ;;  %v1827_v37 = vcombine.high %v68_v33, %v68_v33  ;;  %v2208_v38 = vld [vmem:[%s2952_s23 + $0x140] sm:$0xff]  }
  0x17   :  { %1987 = vmatpush3.bf16.msra.mxu0 %v2182_v10  ;;  %v2199_v27 = vld [vmem:[%s2952_s23 + $0xb0] sm:$0xff]   ;;  %v2203_v31 = vld [vmem:[%s2952_s23 + $0xb8] sm:$0xff]   ;;  %v2209_v39 = vld [vmem:[%s2952_s23 + $0x1c0] sm:$0xff]   ;;  %651 = vmatprep.mubr.bf16.mxu0 %v1825_v35 }
  0x18   :  { %2009 = vmatpush3.bf16.msra.mxu1 %v2183_v11  ;;  %1988 = vmatprep.subr.bf16.mxu0 %v2184_v12  ;;  %v2210_v40 = vld [vmem:[%s2952_s23 + $0x100] sm:$0xff]   ;;  %v2212_v42 = vld [vmem:[%s2952_s23 + $0x148] sm:$0xff]   ;;  %v2216_v46 = vld [vmem:[%s2952_s23 + $0x150] sm:$0xff]  }
  0x19   :  { %2010 = vmatprep.subr.bf16.mxu1 %v2185_v13  ;;  %691 = vmatprep.mubr.bf16.mxu1 %v1827_v37  ;;  %v2211_v41 = vld [vmem:[%s2952_s23 + $0x180] sm:$0xff]   ;;  %v2213_v43 = vld [vmem:[%s2952_s23 + $0x1c8] sm:$0xff]   ;;  %v2217_v47 = vld [vmem:[%s2952_s23 + $0x1d0] sm:$0xff]   ;;  %v2348_v13 = vmov 0.0  }
  0x1a   :  { %v2214_v44 = vld [vmem:[%s2952_s23 + $0x108] sm:$0xff]   ;;  %v2218_v48 = vld [vmem:[%s2952_s23 + $0x110] sm:$0xff]   ;;  %v2220_v50 = vld [vmem:[%s2952_s23 + $0x158] sm:$0xff]  }
  0x1b   :  { %1989 = vmatpush3.bf16.msra.mxu0 %v2186_v14  ;;  %v2215_v45 = vld [vmem:[%s2952_s23 + $0x188] sm:$0xff]   ;;  %v2219_v49 = vld [vmem:[%s2952_s23 + $0x190] sm:$0xff]   ;;  %v2221_v51 = vld [vmem:[%s2952_s23 + $0x1d8] sm:$0xff]  }
  0x1c   :  { %2011 = vmatpush3.bf16.msra.mxu1 %v2187_v15  ;;  %1990 = vmatprep.subr.bf16.mxu0 %v2188_v16  ;;  %v2222_v52 = vld [vmem:[%s2952_s23 + $0x118] sm:$0xff]   ;;  %v2224_v54 = vld [vmem:[%s2952_s23 + $0x160] sm:$0xff]   ;;  %v2228_v58 = vld [vmem:[%s2952_s23 + $0x168] sm:$0xff]  }
  0x1d   :  { %2012 = vmatprep.subr.bf16.mxu1 %v2189_v17  ;;  %v2223_v53 = vld [vmem:[%s2952_s23 + $0x198] sm:$0xff]   ;;  %v2225_v55 = vld [vmem:[%s2952_s23 + $0x1e0] sm:$0xff]   ;;  %v2229_v59 = vld [vmem:[%s2952_s23 + $0x1e8] sm:$0xff]  }
  0x1e   :  { %v2226_v56 = vld [vmem:[%s2952_s23 + $0x120] sm:$0xff]   ;;  %v2230_v60 = vld [vmem:[%s2952_s23 + $0x128] sm:$0xff]   ;;  %v2232_v62 = vld [vmem:[%s2952_s23 + $0x170] sm:$0xff]  }
  0x1f   :  { %1991 = vmatpush3.bf16.msra.mxu0 %v2190_v18  ;;  %v2227_v57 = vld [vmem:[%s2952_s23 + $0x1a0] sm:$0xff]   ;;  %v2231_v61 = vld [vmem:[%s2952_s23 + $0x1a8] sm:$0xff]   ;;  %v2233_v63 = vld [vmem:[%s2952_s23 + $0x1f0] sm:$0xff]  }
  0x20   :  { %2013 = vmatpush3.bf16.msra.mxu1 %v2191_v19  ;;  %1992 = vmatprep.subr.bf16.mxu0 %v2192_v20  ;;  %v2234_v0 = vld [vmem:[%s2952_s23 + $0x130] sm:$0xff]   ;;  %v2236_v2 = vld [vmem:[%s2952_s23 + $0x178] sm:$0xff]   ;;  %v2244_v12 = vld [vmem:[%s2954_s25] sm:$0xff]  }
  0x21   :  { %2014 = vmatprep.subr.bf16.mxu1 %v2193_v21  ;;  %v2235_v1 = vld [vmem:[%s2952_s23 + $0x1b0] sm:$0xff]   ;;  %v2237_v3 = vld [vmem:[%s2952_s23 + $0x1f8] sm:$0xff]   ;;  %v2245_v14 = vld [vmem:[%s2954_s25 + $0x8] sm:$0xff]  }
  0x22   :  { %v2238_v4 = vld [vmem:[%s2952_s23 + $0x138] sm:$0xff]   ;;  %v69_v6 = vld [vmem:[%s2953_s29 + $0x10] sm:$0xff]  ;;  %v71_v15 = vld [vmem:[%s2955_s27] sm:$0xff] }
  0x23   :  { %1993 = vmatpush3.bf16.msra.mxu0 %v2194_v22  ;;  %v2239_v5 = vld [vmem:[%s2952_s23 + $0x1b8] sm:$0xff]   ;;  %v1828_v7 = vcombine.low %v69_v6, %v69_v6  ;;  %v1829_v8 = vcombine.high %v69_v6, %v69_v6  ;;  %v780_v16 = vpack.c.bf16 %v71_v15, %v71_v15 }
  0x24   :  { %2015 = vmatpush3.bf16.msra.mxu1 %v2195_v23  ;;  %1994 = vmatprep.subr.bf16.mxu0 %v2196_v24  ;;  %v70_v9 = vld [vmem:[%s2953_s29 + $0x18] sm:$0xff] }
  0x25   :  { %2016 = vmatprep.subr.bf16.mxu1 %v2197_v25  ;;  %v1830_v10 = vcombine.low %v70_v9, %v70_v9  ;;  %v1831_v11 = vcombine.high %v70_v9, %v70_v9 }
  0x27   :  { %1995 = vmatpush3.bf16.msra.mxu0 %v2198_v26 }
  0x28   :  { %2017 = vmatpush3.bf16.msra.mxu1 %v2199_v27  ;;  %1996 = vmatprep.subr.bf16.mxu0 %v2200_v28 }
  0x29   :  { %2018 = vmatprep.subr.bf16.mxu1 %v2201_v29 }
  0x2b   :  { %1997 = vmatpush3.bf16.msra.mxu0 %v2202_v30 }
  0x2c   :  { %2019 = vmatpush3.bf16.msra.mxu1 %v2203_v31  ;;  %2026 = vmatprep.subr.bf16.mxu0 %v2208_v38 }
  0x2d   :  { %2048 = vmatprep.subr.bf16.mxu1 %v2209_v39 }
  0x2e   :  { %652 = vmatmul.mubr.bf16.vlgmr.msra.gmra.mrb[0].mxu0 %v1824_v34 }
  0x2f   :  { %692 = vmatmul.mubr.bf16.vlgmr.msra.gmra.mrb[0].mxu1 %v1826_v36  ;;  %2027 = vmatpush3.bf16.msra.mxu0 %v2210_v40 }
  0x30   :  { %2049 = vmatpush3.bf16.msra.mxu1 %v2211_v41  ;;  %2028 = vmatprep.subr.bf16.mxu0 %v2212_v42 }
  0x31   :  { %2050 = vmatprep.subr.bf16.mxu1 %v2213_v43  ;;  %731 = vmatprep.mubr.bf16.mxu0 %v1829_v8 }
  0x32   :  { %771 = vmatprep.mubr.bf16.mxu1 %v1831_v11 }
  0x33   :  { %2029 = vmatpush3.bf16.msra.mxu0 %v2214_v44 }
  0x34   :  { %2051 = vmatpush3.bf16.msra.mxu1 %v2215_v45  ;;  %2030 = vmatprep.subr.bf16.mxu0 %v2216_v46 }
  0x35   :  { %2052 = vmatprep.subr.bf16.mxu1 %v2217_v47 }
  0x37   :  { %2031 = vmatpush3.bf16.msra.mxu0 %v2218_v48 }
  0x38   :  { %2053 = vmatpush3.bf16.msra.mxu1 %v2219_v49  ;;  %2032 = vmatprep.subr.bf16.mxu0 %v2220_v50 }
  0x39   :  { %2054 = vmatprep.subr.bf16.mxu1 %v2221_v51 }
  0x3b   :  { %2033 = vmatpush3.bf16.msra.mxu0 %v2222_v52 }
  0x3c   :  { %2055 = vmatpush3.bf16.msra.mxu1 %v2223_v53  ;;  %2034 = vmatprep.subr.bf16.mxu0 %v2224_v54 }
  0x3d   :  { %2056 = vmatprep.subr.bf16.mxu1 %v2225_v55 }
  0x3f   :  { %2035 = vmatpush3.bf16.msra.mxu0 %v2226_v56 }
  0x40   :  { %2057 = vmatpush3.bf16.msra.mxu1 %v2227_v57  ;;  %2036 = vmatprep.subr.bf16.mxu0 %v2228_v58 }
  0x41   :  { %2058 = vmatprep.subr.bf16.mxu1 %v2229_v59 }
  0x43   :  { %2037 = vmatpush3.bf16.msra.mxu0 %v2230_v60 }
  0x44   :  { %2059 = vmatpush3.bf16.msra.mxu1 %v2231_v61  ;;  %2038 = vmatprep.subr.bf16.mxu0 %v2232_v62 }
  0x45   :  { %2060 = vmatprep.subr.bf16.mxu1 %v2233_v63 }
  0x47   :  { %2039 = vmatpush3.bf16.msra.mxu0 %v2234_v0 }
  0x48   :  { %2061 = vmatpush3.bf16.msra.mxu1 %v2235_v1  ;;  %2040 = vmatprep.subr.bf16.mxu0 %v2236_v2 }
  0x49   :  { %2062 = vmatprep.subr.bf16.mxu1 %v2237_v3 }
  0x4b   :  { %2041 = vmatpush3.bf16.msra.mxu0 %v2238_v4 }
  0x4c   :  { %2063 = vmatpush3.bf16.msra.mxu1 %v2239_v5  ;;  %2117 = vmatprep.subr.bf16.mxu0 %v2348_v13 }
  0x4d   :  { %2097 = vmatprep.subr.bf16.mxu1 %v2348_v13 }
  0x4e   :  { %732 = vmatmul.mubr.bf16.vlgmr.msra.gmra.mrb[4].mxu0 %v1828_v7 }
  0x4f   :  { %772 = vmatmul.mubr.bf16.vlgmr.msra.gmra.mrb[4].mxu1 %v1830_v10  ;;  %2125 = vmatprep.mubr.msk.bf16.mxu0 %vm2349_vm1, %v2348_v13 }
  0x50   :  { %2098 = vmatpush3.bf16.msra.mxu1 %v2244_v12  ;;  %2101 = vmatprep.mubr.msk.bf16.mxu1 %vm2349_vm1, %v2348_v13 }
  0x51   :  { %2099 = vmatprep.subr.bf16.mxu1 %v2348_v13 }
  0x54   :  { %2100 = vmatpush3.bf16.msra.mxu1 %v2245_v14 }
  0x55   :  { %2105 = vmatprep.subr.bf16.mxu1 %v2348_v13 }
  0x57   :  { %2102 = vmatmul.mubr.msk.bf16.vlgmr.msra.gmra.mrb[8].mxu1 %vm804_vm0, %v780_v16 }
  0x58   :  { %2113 = vmatprep.mubr.msk.bf16.mxu1 %vm2349_vm1, %v2348_v13 }
  0x59   :  { %27 = vsyncpa [#allocation5], 0  ;;  %v2246_v17 = vld [vmem:[%s2929_s6] sm:$0xff]   ;;  %v2248_v19 = vld [vmem:[%s2929_s6 + $0x8] sm:$0xff]   ;;  %s2956_s0 = sld [smem:[#allocation11_spill]]  ;;  %vm889_vm2 = vcmask 523264  }
  0x5a   :  { %2106 = vmatpush3.bf16.msra.mxu1 %v2246_v17  ;;  %v2247_v18 = vld [vmem:[%s2931_s8] sm:$0xff]   ;;  %v2249_v20 = vld [vmem:[%s2931_s8 + $0x8] sm:$0xff]   ;;  %v2250_v21 = vld [vmem:[%s2929_s6 + $0x10] sm:$0xff]   ;;  %s2351_s1 = smov 64  }
  0x5b   :  { %2107 = vmatprep.subr.bf16.mxu1 %v2348_v13  ;;  %2118 = vmatpush3.bf16.msra.mxu0 %v2247_v18  ;;  %v2251_v22 = vld [vmem:[%s2931_s8 + $0x10] sm:$0xff]   ;;  %v2252_v23 = vld [vmem:[%s2929_s6 + $0x18] sm:$0xff]   ;;  %v1896_v50 = vld [vmem:[%s2928_s5] ss:$0 sm:$0xff]  ;;  %s2352_s6 = smov [#allocation2]  }
  0x5c   :  { %2119 = vmatprep.subr.bf16.mxu0 %v2348_v13  ;;  %v2253_v24 = vld [vmem:[%s2931_s8 + $0x18] sm:$0xff]   ;;  %v2254_v59 = vld [vmem:[%s2933_s10] sm:$0xff]   ;;  %v2256_v62 = vld [vmem:[%s2933_s10 + $0x8] sm:$0xff]   ;;  %s1801_s8 = sshll.u32 %s2352_s6, 4  ;;  %s1802_s8 = int_to_ptr.vmem [resolvable:$true] %s1801_s8 }
  0x5d   :  { %v2255_v61 = vld [vmem:[%s2934_s11] sm:$0xff]   ;;  %v2257_v63 = vld [vmem:[%s2934_s11 + $0x8] sm:$0xff]   ;;  %s2300_s21 = scalar_lea.vmem %s1802_s8, 512  ;;  %p2305_p1 = scmp.lt.s32.totalorder %s1802_s8, %s1802_s8 }
  0x5e   :  { %2108 = vmatpush3.bf16.msra.mxu1 %v2248_v19  ;;  %v1900_v0 = vld [vmem:[%s2930_s7] ss:$0 sm:$0xff]  ;;  %v2259_v16 = vld [vmem:[%s2936_s13 + $0x8] sm:$0xff]   ;;  %p2301_p0 = scmp.ne.s32.totalorder %s1802_s8, %s2300_s21  ;;  %p2306_p2 = scmp.lt.s32.totalorder %s2300_s21, %s2300_s21 }
  0x5f   :  { %2109 = vmatprep.subr.bf16.mxu1 %v2348_v13  ;;  %2120 = vmatpush3.bf16.msra.mxu0 %v2249_v20  ;;  %v1823_v27 = vld [vmem:[%s2956_s0] ss:$0 sm:$0xff]  ;;  %v1214_v19 = vld [vmem:[%s2938_s15 + $0x8] sm:$0xff] }
  0x60   :  { %2121 = vmatprep.subr.bf16.mxu0 %v2348_v13  ;;  %v1906_v4 = vld [vmem:[%s2932_s9] ss:$0 sm:$0xff]  ;;  %p2307_p3 = por %p2306_p2, %p2305_p1 }
  0x61   :  { %v2258_v15 = vld [vmem:[%s2936_s13] sm:$0xff]  }
  0x62   :  { %2110 = vmatpush3.bf16.msra.mxu1 %v2250_v21  ;;  %v1213_v17 = vld [vmem:[%s2938_s15] sm:$0xff]  ;;  %p2308_p4 = pnand %p2307_p3, %p2301_p0 }
  0x63   :  { %2111 = vmatprep.subr.bf16.mxu1 %v2348_v13  ;;  %2122 = vmatpush3.bf16.msra.mxu0 %v2251_v22  ;;  %v1217_v18 = vld [vmem:[%s2938_s15 + $0x20] sm:$0xff]  ;;  %v1218_v22 = vld [vmem:[%s2938_s15 + $0x28] sm:$0xff] }
  0x64   :  { %2123 = vmatprep.subr.bf16.mxu0 %v2348_v13  ;;  %v1923_v20 = vcombine.low %v1213_v17, %v1217_v18  ;;  %v1924_v21 = vcombine.high %v1213_v17, %v1217_v18  ;;  %v1228_v17 = vld [vmem:[%s2938_s15 + $0x78] sm:$0xff] }
  0x66   :  { %2112 = vmatpush3.bf16.msra.mxu1 %v2252_v23  ;;  %v1221_v23 = vld [vmem:[%s2938_s15 + $0x40] sm:$0xff] }
  0x67   :  { %2129 = vmatprep.subr.bf16.mxu1 %v2348_v13  ;;  %2124 = vmatpush3.bf16.msra.mxu0 %v2253_v24  ;;  %v1225_v24 = vld [vmem:[%s2938_s15 + $0x60] sm:$0xff] }
  0x68   :  { %2137 = vmatprep.subr.bf16.mxu0 %v2348_v13 }
 0x101   :  { %v1998_v25 = vpop.f32.mrb[0].mxu0 }
 0x102   :  { %v2020_v26 = vpop.f32.mrb[0].mxu1  ;;  %v1999_v28 = vpop.f32.mrb[1].mxu0 }
 0x103   :  { %v2021_v29 = vpop.f32.mrb[1].mxu1  ;;  %v2000_v30 = vadd.f32 %v1999_v28, %v1998_v25  ;;  %v2001_v33 = vpop.f32.mrb[2].mxu0  ;;  %v1925_v25 = vcombine.low %v1214_v19, %v1218_v22  ;;  %v1931_v28 = vcombine.low %v1221_v23, %v1225_v24 }
 0x104   :  { %v2022_v31 = vadd.f32 %v2021_v29, %v2020_v26  ;;  %v2023_v32 = vpop.f32.mrb[2].mxu1  ;;  %v2002_v35 = vpop.f32.mrb[3].mxu0  ;;  %v1926_v26 = vcombine.high %v1214_v19, %v1218_v22  ;;  %v1229_v29 = vld [vmem:[%s2938_s15 + $0x80] sm:$0xff]  ;;  %v1235_v22 = vld [vmem:[%s2938_s15 + $0xb0] sm:$0xff] }
 0x105   :  { %v2024_v34 = vpop.f32.mrb[3].mxu1  ;;  %v654_v36 = vadd.f32 %v2000_v30, %v1823_v27  ;;  %v1932_v27 = vcombine.high %v1221_v23, %v1225_v24  ;;  %v1233_v30 = vld [vmem:[%s2938_s15 + $0xa0] sm:$0xff]  ;;  %v1232_v23 = vld [vmem:[%s2938_s15 + $0x98] sm:$0xff] }
 0x106   :  { %v1939_v32 = vcombine.low %v1229_v29, %v1233_v30  ;;  %v1236_v24 = vld [vmem:[%s2938_s15 + $0xb8] sm:$0xff] }
 0x107   :  { %v694_v37 = vadd.f32 %v2022_v31, %v654_v36  ;;  %v1940_v31 = vcombine.high %v1229_v29, %v1233_v30  ;;  %v1239_v29 = vld [vmem:[%s2938_s15 + $0xd0] sm:$0xff] }
 0x108   :  { %v1243_v30 = vld [vmem:[%s2938_s15 + $0xf0] sm:$0xff] }
 0x121   :  { %v2042_v38 = vpop.f32.mrb[4].mxu0 }
 0x122   :  { %v2064_v39 = vpop.f32.mrb[4].mxu1  ;;  %v2043_v40 = vpop.f32.mrb[5].mxu0 }
 0x123   :  { %v2065_v41 = vpop.f32.mrb[5].mxu1  ;;  %v2044_v42 = vadd.f32 %v2043_v40, %v2042_v38  ;;  %v2045_v45 = vpop.f32.mrb[6].mxu0 }
 0x124   :  { %v2066_v43 = vadd.f32 %v2065_v41, %v2064_v39  ;;  %v2067_v44 = vpop.f32.mrb[6].mxu1  ;;  %v2046_v47 = vpop.f32.mrb[7].mxu0 }
 0x125   :  { %v2068_v46 = vpop.f32.mrb[7].mxu1  ;;  %v734_v48 = vadd.f32 %v2044_v42, %v694_v37  ;;  %v1918_v37 = vld [vmem:[%s2935_s12] ss:$0 sm:$0xff]  ;;  %v1222_v42 = vld [vmem:[%s2938_s15 + $0x48] sm:$0xff] }
 0x127   :  { %v774_v49 = vadd.f32 %v2066_v43, %v734_v48  ;;  %v1226_v43 = vld [vmem:[%s2938_s15 + $0x68] sm:$0xff] }
 0x128   :  { %v1934_v47 = vcombine.high %v1222_v42, %v1226_v43  ;;  %v1230_v48 = vld [vmem:[%s2938_s15 + $0x88] sm:$0xff] }
 0x129   :  { %v779_v51 = vmax.f32 %v774_v49, 0.0  ;;  %v1234_v49 = vld [vmem:[%s2938_s15 + $0xa8] sm:$0xff] }
 0x12a   :  { %v842_v52 = vpop.f32.mrb[8].mxu1 }
 0x12b   :  { %v843_v53 = vadd.f32 %v1896_v50, %v842_v52  ;;  %v2103_v54 = vpop.f32.mrb[9].mxu1  ;;  %v849_v55 = vpack.c.bf16 %v779_v51, %v779_v51  ;;  %v1933_v50 = vcombine.low %v1222_v42, %v1226_v43  ;;  %v1942_v51 = vcombine.high %v1230_v48, %v1234_v49  ;;  %v2263_v42 = vld [vmem:[%s2940_s17 + $0x18] sm:$0xff]  }
 0x12c   :  { %v845_v56 = vpop.f32.mrb[10].mxu1  ;;  %v1941_v52 = vcombine.low %v1230_v48, %v1234_v49  ;;  %v1241_v54 = vld [vmem:[%s2938_s15 + $0xe0] sm:$0xff] }
 0x12d   :  { %v848_v57 = vmax.f32 %v843_v53, 0.0  ;;  %v2104_v58 = vpop.f32.mrb[11].mxu1  ;;  %2114 = vmatmul.mubr.msk.bf16.vlgmr.msra.gmra.mrb[12].mxu1 %vm889_vm2, %v849_v55  ;;  %v1237_v53 = vld [vmem:[%s2938_s15 + $0xc0] sm:$0xff]  ;;  %v1238_v55 = vld [vmem:[%s2938_s15 + $0xc8] sm:$0xff] }
 0x12e   :  { %2133 = vmatprep.mubr.msk.bf16.mxu1 %vm2349_vm1, %v2348_v13  ;;  %2130 = vmatpush3.bf16.msra.mxu1 %v2255_v61  ;;  %v1948_v56 = vcombine.high %v1237_v53, %v1241_v54  ;;  %v1947_v58 = vcombine.low %v1237_v53, %v1241_v54  ;;  %v1215_v61 = vld [vmem:[%s2938_s15 + $0x10] sm:$0xff]  ;;  %v1245_v48 = vld [vmem:[%s2939_s16] sm:$0xff] }
 0x12f   :  { %v933_v60 = vpack.c.bf16 %v848_v57, %v848_v57  ;;  %2131 = vmatprep.subr.bf16.mxu1 %v2348_v13  ;;  %v1242_v57 = vld [vmem:[%s2938_s15 + $0xe8] sm:$0xff] }
 0x131   :  { %2126 = vmatmul.mubr.msk.bf16.vlgmr.msra.gmra.mrb[8].mxu0 %vm889_vm2, %v933_v60  ;;  %v1950_v60 = vcombine.high %v1238_v55, %v1242_v57 }
 0x132   :  { %2138 = vmatpush3.bf16.msra.mxu0 %v2254_v59  ;;  %2141 = vmatprep.mubr.msk.bf16.mxu0 %vm2349_vm1, %v2348_v13  ;;  %v1949_v59 = vcombine.low %v1238_v55, %v1242_v57 }
 0x133   :  { %2139 = vmatprep.subr.bf16.mxu0 %v2348_v13  ;;  %2132 = vmatpush3.bf16.msra.mxu1 %v2257_v63  ;;  %v1216_v63 = vld [vmem:[%s2938_s15 + $0x18] sm:$0xff] }
 0x134   :  { %2145 = vmatprep.subr.bf16.mxu1 %v2348_v13 }
 0x136   :  { %2140 = vmatpush3.bf16.msra.mxu0 %v2256_v62  ;;  %v1219_v62 = vld [vmem:[%s2938_s15 + $0x30] sm:$0xff] }
 0x137   :  { %1450 = vmatprep.subr.bf16.mxu0 %v1924_v21  ;;  %v1231_v21 = vld [vmem:[%s2938_s15 + $0x90] sm:$0xff] }
 0x200   :  { %v927_v1 = vpop.f32.mrb[12].mxu1 }
 0x201   :  { %v928_v2 = vadd.f32 %v1900_v0, %v927_v1  ;;  %v2115_v3 = vpop.f32.mrb[13].mxu1  ;;  %v1928_v0 = vcombine.high %v1215_v61, %v1219_v62  ;;  %v1220_v1 = vld [vmem:[%s2938_s15 + $0x38] sm:$0xff] }
 0x202   :  { %v930_v5 = vpop.f32.mrb[14].mxu1  ;;  %v1929_v3 = vcombine.low %v1216_v63, %v1220_v1 }
 0x203   :  { %v1016_v6 = vpack.c.bf16 %v928_v2, %v928_v2  ;;  %v2116_v7 = vpop.f32.mrb[15].mxu1  ;;  %v1927_v2 = vcombine.low %v1215_v61, %v1219_v62  ;;  %v2350_v5 = vmov 0  }
 0x204   :  { %v1010_v8 = vpop.f32.mrb[8].mxu0 }
 0x205   :  { %v1011_v9 = vadd.f32 %v1906_v4, %v1010_v8  ;;  %v2127_v10 = vpop.f32.mrb[9].mxu0  ;;  %2142 = vmatmul.mubr.msk.bf16.vlgmr.msra.gmra.mrb[12].mxu0 %vm804_vm0, %v1016_v6  ;;  %v1930_v4 = vcombine.high %v1216_v63, %v1220_v1  ;;  %v1919_v6 = vld [vmem:[%s2937_s14] ss:$0 sm:$0xff] }
 0x206   :  { %v1013_v11 = vpop.f32.mrb[10].mxu0  ;;  %1451 = vmatpush1.bf16.msra.mxu0 %v1923_v20  ;;  %1482 = vmatprep.mubr.bf16.mxu0 %v2350_v5 }
 0x207   :  { %v1021_v12 = vpack.c.bf16 %v1011_v9, %v1011_v9  ;;  %v2128_v14 = vpop.f32.mrb[11].mxu0  ;;  %1452 = vmatprep.subr.bf16.mxu0 %v1932_v27  ;;  %v1223_v11 = vld [vmem:[%s2938_s15 + $0x50] sm:$0xff]  ;;  %v1944_v27 = vcombine.high %v1231_v21, %v1235_v22 }
 0x209   :  { %2134 = vmatmul.mubr.msk.bf16.vlgmr.msra.gmra.mrb[16].mxu1 %vm804_vm0, %v1021_v12  ;;  %v1227_v12 = vld [vmem:[%s2938_s15 + $0x70] sm:$0xff] }
 0x20a   :  { %2149 = vmatprep.mubr.msk.bf16.mxu1 %vm2349_vm1, %v2348_v13  ;;  %2146 = vmatpush3.bf16.msra.mxu1 %v2258_v15  ;;  %v1936_v19 = vcombine.high %v1223_v11, %v1227_v12 }
 0x20b   :  { %2147 = vmatprep.subr.bf16.mxu1 %v2348_v13  ;;  %1453 = vmatpush1.bf16.msra.mxu0 %v1931_v28  ;;  %v1946_v28 = vcombine.high %v1232_v23, %v1236_v24 }
 0x20c   :  { %1454 = vmatprep.subr.bf16.mxu0 %v1940_v31  ;;  %v1240_v31 = vld [vmem:[%s2938_s15 + $0xd8] sm:$0xff] }
 0x20e   :  { %2148 = vmatpush3.bf16.msra.mxu1 %v2259_v16  ;;  %v1224_v16 = vld [vmem:[%s2938_s15 + $0x58] sm:$0xff] }
 0x20f   :  { %1491 = vmatprep.subr.bf16.mxu1 %v1926_v26  ;;  %1455 = vmatpush1.bf16.msra.mxu0 %v1939_v32  ;;  %v1938_v20 = vcombine.high %v1224_v16, %v1228_v17  ;;  %v1937_v26 = vcombine.low %v1224_v16, %v1228_v17  ;;  %v1244_v32 = vld [vmem:[%s2938_s15 + $0xf8] sm:$0xff] }
 0x210   :  { %1456 = vmatprep.subr.bf16.mxu0 %v1948_v56 }
 0x213   :  { %1457 = vmatpush1.bf16.msra.mxu0 %v1947_v58 }
 0x214   :  { %1532 = vmatprep.subr.bf16.mxu0 %v1928_v0 }
 0x2d8   :  { %v1130_v33 = vpop.f32.mrb[12].mxu0 }
 0x2d9   :  { %v2143_v34 = vpop.f32.mrb[13].mxu0 }
 0x2da   :  { %v1133_v35 = vpop.f32.mrb[14].mxu0  ;;  %v1945_v34 = vcombine.low %v1232_v23, %v1236_v24 }
 0x2db   :  { %v2144_v38 = vpop.f32.mrb[15].mxu0  ;;  %v1952_v35 = vcombine.high %v1239_v29, %v1243_v30 }
 0x2dc   :  { %v1075_v36 = vpop.f32.mrb[16].mxu1  ;;  %v1953_v38 = vcombine.low %v1240_v31, %v1244_v32 }
 0x2dd   :  { %v1131_v39 = vadd.f32 %v1130_v33, %v1075_v36  ;;  %v2135_v40 = vpop.f32.mrb[17].mxu1  ;;  %v1943_v33 = vcombine.low %v1231_v21, %v1235_v22  ;;  %v1954_v36 = vcombine.high %v1240_v31, %v1244_v32 }
 0x2de   :  { %v1078_v41 = vpop.f32.mrb[18].mxu1  ;;  %v2261_v40 = vld [vmem:[%s2940_s17 + $0x8] sm:$0xff]  }
 0x2df   :  { %v2793_v44 = vadd.f32 %v1918_v37, %v1131_v39  ;;  %v2136_v45 = vpop.f32.mrb[19].mxu1  ;;  %v1951_v37 = vcombine.low %v1239_v29, %v1243_v30  ;;  %v2260_v39 = vld [vmem:[%s2940_s17] sm:$0xff]   ;;  %v2262_v41 = vld [vmem:[%s2940_s17 + $0x10] sm:$0xff]  }
 0x2e0   :  { %v1247_v45 = vlaneseq }
 0x2e1   :  { %v1144_v46 = vpack.c.bf16 %v2793_v44, %v2793_v44 }
 0x2e3   :  { %2150 = vmatmul.mubr.msk.bf16.vlgmr.msra.gmra.mrb[20].mxu1 %vm804_vm0, %v1144_v46  ;;  %v1248_v46 = vshrl.u32 %v1247_v45, 7 }
 0x2e4   :  { %1492 = vmatpush1.bf16.msra.mxu1 %v1925_v25  ;;  %1523 = vmatprep.mubr.bf16.mxu1 %v2350_v5  ;;  %v1935_v25 = vcombine.low %v1223_v11, %v1227_v12 }
 0x2e5   :  { %1493 = vmatprep.subr.bf16.mxu1 %v1934_v47  ;;  %v1249_v47 = vsub.s32 0, %v1248_v46  ;;  %v1257_v49 = vsub.s32 2, %v1248_v46 }
 0x2e7   :  { %v1258_v53 = vrot.slane %v1245_v48, %v1257_v49 }
 0x2e8   :  { %1494 = vmatpush1.bf16.msra.mxu1 %v1933_v50  ;;  %v1253_v50 = vsub.s32 1, %v1248_v46 }
 0x2e9   :  { %1495 = vmatprep.subr.bf16.mxu1 %v1942_v51  ;;  %v1261_v51 = vsub.s32 3, %v1248_v46 }
 0x2ea   :  { %v1254_v54 = vrot.slane %v1245_v48, %v1253_v50 }
 0x2eb   :  { %v1262_v55 = vrot.slane %v1245_v48, %v1261_v51 }
 0x2ec   :  { %1496 = vmatpush1.bf16.msra.mxu1 %v1941_v52  ;;  %v1250_v52 = vrot.slane %v1245_v48, %v1249_v47 }
 0x2ed   :  { %1497 = vmatprep.subr.bf16.mxu1 %v1950_v60 }
 0x2f0   :  { %1498 = vmatpush1.bf16.msra.mxu1 %v1949_v59 }
 0x2f1   :  { %1573 = vmatprep.subr.bf16.mxu1 %v1930_v4 }
 0x3b6   :  { %v1205_v7 = vpop.f32.mrb[20].mxu1 }
 0x3b7   :  { %v1206_v8 = vadd.f32 %v1919_v6, %v1205_v7  ;;  %v2151_v9 = vpop.f32.mrb[21].mxu1  ;;  %v1265_v7 = vsub.s32 4, %v1248_v46 }
 0x3b8   :  { %v1208_v10 = vpop.f32.mrb[22].mxu1  ;;  %v1269_v9 = vsub.s32 5, %v1248_v46 }
 0x3b9   :  { %v1211_v14 = vmax.f32 %v1206_v8, 0.0  ;;  %v2152_v15 = vpop.f32.mrb[23].mxu1  ;;  %v1273_v8 = vsub.s32 6, %v1248_v46  ;;  %v1277_v10 = vsub.s32 7, %v1248_v46  ;;  %v1266_v11 = vrot.slane %v1245_v48, %v1265_v7 }
 0x3bb   :  { %v1212_v18 = vpack.c.bf16 %v1211_v14, %v1211_v14  ;;  %v1274_v12 = vrot.slane %v1245_v48, %v1273_v8  ;;  %v1270_v14 = vrot.slane %v1245_v48, %v1269_v9  ;;  %v1278_v16 = vrot.slane %v1245_v48, %v1277_v10 }
 0x3bd   :  { %1714 = vrot.lane.b32.xlu0 %v1212_v18, %s2351_s1  ;;  %1955 = vmatmul.mubr.msk.bf16.vlgmr.msra.gmra.mrb[16].mxu0 %vm889_vm2, %v1212_v18 }
 0x3be   :  { %1956 = vmatmul.mubr.msk.bf16.vlgmr.msra.gmra.mrb[24].mxu1 %vm889_vm2, %v1212_v18  ;;  %1533 = vmatpush1.bf16.msra.mxu0 %v1927_v2 }
 0x3bf   :  { %1574 = vmatpush1.bf16.msra.mxu1 %v1929_v3  ;;  %1534 = vmatprep.subr.bf16.mxu0 %v1936_v19 }
 0x3c0   :  { %1575 = vmatprep.subr.bf16.mxu1 %v1938_v20  ;;  %1564 = vmatprep.mubr.bf16.mxu0 %v2350_v5 }
 0x3c1   :  { %1605 = vmatprep.mubr.bf16.mxu1 %v2350_v5 }
 0x3c2   :  { %1535 = vmatpush1.bf16.msra.mxu0 %v1935_v25 }
 0x3c3   :  { %1576 = vmatpush1.bf16.msra.mxu1 %v1937_v26  ;;  %1536 = vmatprep.subr.bf16.mxu0 %v1944_v27 }
 0x3c4   :  { %1577 = vmatprep.subr.bf16.mxu1 %v1946_v28 }
 0x3c6   :  { %1537 = vmatpush1.bf16.msra.mxu0 %v1943_v33 }
 0x3c7   :  { %1578 = vmatpush1.bf16.msra.mxu1 %v1945_v34  ;;  %1538 = vmatprep.subr.bf16.mxu0 %v1952_v35 }
 0x3c8   :  { %1579 = vmatprep.subr.bf16.mxu1 %v1954_v36 }
 0x3ca   :  { %1539 = vmatpush1.bf16.msra.mxu0 %v1951_v37 }
 0x3cb   :  { %1580 = vmatpush1.bf16.msra.mxu1 %v1953_v38  ;;  %2153 = vmatprep.subr.bf16.mxu0 %v2348_v13 }
 0x3cd   :  { %1957 = vmatmul.mubr.msk.bf16.vlgmr.msra.gmra.mrb[20].mxu0 %vm889_vm2, %v1212_v18 }
 0x3ce   :  { %1958 = vmatmul.mubr.msk.bf16.vlgmr.msra.gmra.mrb[28].mxu1 %vm889_vm2, %v1212_v18  ;;  %2154 = vmatpush3.bf16.msra.mxu0 %v2260_v39 }
 0x3cf   :  { %2155 = vmatprep.subr.bf16.mxu0 %v2348_v13  ;;  %2161 = vmatprep.mubr.msk.bf16.mxu0 %vm2349_vm1, %v2348_v13 }
 0x3d2   :  { %2156 = vmatpush3.bf16.msra.mxu0 %v2261_v40 }
 0x3d3   :  { %2157 = vmatprep.subr.bf16.mxu0 %v2348_v13 }
 0x3d6   :  { %2158 = vmatpush3.bf16.msra.mxu0 %v2262_v41 }
 0x3d7   :  { %2159 = vmatprep.subr.bf16.mxu0 %v2348_v13 }
 0x3da   :  { %2160 = vmatpush3.bf16.msra.mxu0 %v2263_v42 }
 0x42f   :  { %v1715_v43 = vpop.permute.xlu0 %1714 }
 0x430   :  { %2162 = vmatmul.mubr.msk.bf16.vlgmr.msra.gmra.mrb[24].mxu0 %vm889_vm2, %v1715_v43 }
 0x490   :  { %v1484_v56 = vpop.f32.mrb[16].mxu0 }
 0x491   :  { %v1485_v13 = vadd.f32 %v1484_v56, %v1250_v52  ;;  %v1525_v57 = vpop.f32.mrb[24].mxu1  ;;  %v1486_v58 = vpop.f32.mrb[17].mxu0 }
 0x492   :  { %v1526_v59 = vadd.f32 %v1525_v57, %v1258_v53  ;;  %v1487_v60 = vadd.f32 %v1486_v58, %v1254_v54  ;;  %v1527_v61 = vpop.f32.mrb[25].mxu1  ;;  %v1488_v62 = vpop.f32.mrb[18].mxu0 }
 0x493   :  { %v1959_v63 = vmul.f32 -1.442695, %v1485_v13  ;;  %v1528_v0 = vadd.f32 %v1527_v61, %v1262_v55  ;;  %v1529_v1 = vpop.f32.mrb[26].mxu1  ;;  %v1489_v2 = vpop.f32.mrb[19].mxu0 }
 0x494   :  { %v1961_v3 = vmul.f32 -1.442695, %v1526_v59  ;;  %v1960_v4 = vmul.f32 -1.442695, %v1487_v60  ;;  %v1530_v5 = vpop.f32.mrb[27].mxu1 }
 0x495   :  { %2264 = vpow2.f32 %v1959_v63  ;;  %v1962_v6 = vmul.f32 -1.442695, %v1528_v0  ;;  %v1971_v60 = vld [vmem:[%s2941_s18] ss:$0 sm:$0xff] }
 0x496   :  { %2266 = vpow2.f32 %v1961_v3 }
 0x497   :  { %2268 = vpow2.f32 %v1960_v4 }
 0x498   :  { %2270 = vpow2.f32 %v1962_v6 }
 0x49f   :  { %v2265_v15 = vpop.eup %2264 }
 0x4a0   :  { %v2267_v17 = vpop.eup %2266  ;;  %v1638_v18 = vadd.f32 1.0, %v2265_v15  ;;  %v1566_v19 = vpop.f32.mrb[20].mxu0 }
 0x4a1   :  { %v2269_v20 = vpop.eup %2268  ;;  %v1640_v21 = vadd.f32 1.0, %v2267_v17  ;;  %v1567_v22 = vadd.f32 %v1566_v19, %v1266_v11  ;;  %v1607_v23 = vpop.f32.mrb[28].mxu1 }
 0x4a2   :  { %v1568_v24 = vpop.f32.mrb[21].mxu0  ;;  %v2271_v25 = vpop.eup %2270  ;;  %2272 = vrcp.f32 %v1638_v18  ;;  %v1639_v26 = vadd.f32 1.0, %v2269_v20  ;;  %v1608_v27 = vadd.f32 %v1607_v23, %v1274_v12 }
 0x4a3   :  { %v1569_v28 = vadd.f32 %v1568_v24, %v1270_v14  ;;  %v1609_v29 = vpop.f32.mrb[29].mxu1  ;;  %v1570_v30 = vpop.f32.mrb[22].mxu0  ;;  %2274 = vrcp.f32 %v1640_v21  ;;  %v1641_v31 = vadd.f32 1.0, %v2271_v25  ;;  %v1963_v32 = vmul.f32 -1.442695, %v1567_v22 }
 0x4a4   :  { %v1610_v33 = vadd.f32 %v1609_v29, %v1278_v16  ;;  %v1611_v34 = vpop.f32.mrb[30].mxu1  ;;  %v1571_v35 = vpop.f32.mrb[23].mxu0  ;;  %2276 = vrcp.f32 %v1639_v26  ;;  %v1965_v36 = vmul.f32 -1.442695, %v1608_v27 }
 0x4a5   :  { %v1964_v37 = vmul.f32 -1.442695, %v1569_v28  ;;  %v1612_v38 = vpop.f32.mrb[31].mxu1  ;;  %2278 = vrcp.f32 %v1641_v31 }
 0x4a6   :  { %v1966_v39 = vmul.f32 -1.442695, %v1610_v33  ;;  %2280 = vpow2.f32 %v1963_v32 }
 0x4a7   :  { %2282 = vpow2.f32 %v1965_v36 }
 0x4a8   :  { %2284 = vpow2.f32 %v1964_v37 }
 0x4a9   :  { %2286 = vpow2.f32 %v1966_v39 }
 0x4ac   :  { %v2273_v40 = vpop.eup %2272 }
 0x4ad   :  { %v2275_v41 = vpop.eup %2274 }
 0x4ae   :  { %v2277_v42 = vpop.eup %2276 }
 0x4af   :  { %v2279_v43 = vpop.eup %2278  ;;  %v1978_v45 = vpack.c.bf16 %v2277_v42, %v2273_v40 }
 0x4b0   :  { %v2281_v46 = vpop.eup %2280  ;;  %v1979_v47 = vpack.c.bf16 %v2279_v43, %v2275_v41 }
 0x4b1   :  { %v2283_v48 = vpop.eup %2282  ;;  %v1642_v49 = vadd.f32 1.0, %v2281_v46  ;;  %1694 = vst [vmem:[#allocation2] sm:$0xff] %v1978_v45 }
 0x4b2   :  { %v2285_v50 = vpop.eup %2284  ;;  %v1644_v51 = vadd.f32 1.0, %v2283_v48  ;;  %1695 = vst [vmem:[#allocation2 + $0x8] sm:$0xff] %v1979_v47 }
 0x4b3   :  { %v2287_v52 = vpop.eup %2286  ;;  %2288 = vrcp.f32 %v1642_v49  ;;  %v1643_v53 = vadd.f32 1.0, %v2285_v50 }
 0x4b4   :  { %2290 = vrcp.f32 %v1644_v51  ;;  %v1645_v54 = vadd.f32 1.0, %v2287_v52 }
 0x4b5   :  { %2292 = vrcp.f32 %v1643_v53 }
 0x4b6   :  { %2294 = vrcp.f32 %v1645_v54 }
 0x4bd   :  { %v2289_v55 = vpop.eup %2288 }
 0x4be   :  { %v2291_v56 = vpop.eup %2290 }
 0x4bf   :  { %v2293_v13 = vpop.eup %2292 }
 0x4c0   :  { %v2295_v57 = vpop.eup %2294  ;;  %v1980_v58 = vpack.c.bf16 %v2293_v13, %v2289_v55 }
 0x4c1   :  { %v1981_v59 = vpack.c.bf16 %v2295_v57, %v2291_v56 }
 0x4c2   :  { %1696 = vst [vmem:[#allocation2 + $0x10] sm:$0xff] %v1980_v58 }
 0x4c3   :  { %1697 = vst [vmem:[#allocation2 + $0x18] sm:$0xff] %v1981_v59 }
 0x503   :  { %v1777_v61 = vpop.f32.mrb[24].mxu0 }
 0x504   :  { %v1778_v62 = vadd.f32 %v1971_v60, %v1777_v61  ;;  %v2163_v63 = vpop.f32.mrb[25].mxu0 }
 0x505   :  { %v1780_v0 = vpop.f32.mrb[26].mxu0 }
 0x506   :  { %v1977_v1 = vmul.f32 -1.442695, %v1778_v62  ;;  %v2164_v2 = vpop.f32.mrb[27].mxu0 }
 0x508   :  { %2296 = vpow2.f32 %v1977_v1 }
 0x512   :  { %v2297_v3 = vpop.eup %2296 }
 0x513   :  { %v1786_v4 = vadd.f32 1.0, %v2297_v3 }
 0x515   :  { %2298 = vrcp.f32 %v1786_v4 }
 0x516   :  { %2311 = shalt.err (!%p2308_p4)
}
 0x517   :  { %s2312_s13 = scalar_lea.hbm %s2942_s19, 512 }
 0x518   :  { %p2313_p5 = scmp.ne.s32.totalorder %s2942_s19, %s2312_s13  ;;  %p2316_p6 = scmp.lt.u32.totalorder %s2312_s13, %s2942_s19 }
 0x51a   :  { %p2318_p7 = pnand %p2316_p6, %p2313_p5 }
 0x51c   :  { %2321 = shalt.err (!%p2318_p7)
}
 0x51d   :  { %1804 = dma.vmem_to_hbm [thread:$0]  %s1802_s8, 512, %s2942_s19, [#allocation3]  }
 0x51e   :  { %s2353_s3 = smov 32   ;;  %s2354_s26 = smov [#allocation4]  }
 0x51f   :  { %v2299_v5 = vpop.eup %2298  ;;  %s1811_s29 = sshll.u32 %s2354_s26, 4  ;;  %s1812_s29 = int_to_ptr.vmem [resolvable:$true] %s1811_s29 }
 0x520   :  { %1790 = vrot.lane.b32.xlu0 %v2299_v5, %s2353_s3  ;;  %s2322_s10 = scalar_lea.vmem %s1812_s29, 128  ;;  %p2327_p9 = scmp.lt.s32.totalorder %s1812_s29, %s1812_s29 }
 0x521   :  { %p2323_p8 = scmp.ne.s32.totalorder %s1812_s29, %s2322_s10  ;;  %p2328_p10 = scmp.lt.s32.totalorder %s2322_s10, %s2322_s10 }
 0x523   :  { %p2329_p11 = por %p2328_p10, %p2327_p9 }
 0x525   :  { %p2330_p12 = pnand %p2329_p11, %p2323_p8 }
 0x592   :  { %v1791_v6 = vpop.permute.xlu0 %1790 }
 0x593   :  { %v1793_v7 = vsel %vm804_vm0, %v2793_v44, %v1791_v6 }
 0x594   :  { %1794 = vst.msk [vmem:[#allocation4] sm:$0xff] %vm889_vm2, %v1793_v7 }
 0x595   :  { %2333 = shalt.err (!%p2330_p12)
}
 0x596   :  { %s2334_s11 = scalar_lea.hbm %s2943_s20, 128 }
 0x597   :  { %p2335_p13 = scmp.ne.s32.totalorder %s2943_s20, %s2334_s11  ;;  %p2338_p0 = scmp.lt.u32.totalorder %s2334_s11, %s2943_s20 }
 0x599   :  { %p2340_p1 = pnand %p2338_p0, %p2335_p13 }
 0x59b   :  { %2343 = shalt.err (!%p2340_p1)
}
 0x59c   :  { %1814 = dma.vmem_to_hbm [thread:$0]  %s1812_s29, 128, %s2943_s20, [#allocation5]  }
 0x59d   :  { %2344 = dma.done.wait [#allocation3], 512  }
 0x59e   :  { %2345 = vsyncadd [#allocation3], 4294966784 }
 0x59f   :  { %2346 = dma.done.wait [#allocation5], 128  }
 0x5a0   :  { %2347 = vsyncadd [#allocation5], 4294967168 }
 0x5a1   :  { %1821 = vsyncpa [#allocation3], 1 }
 0x5a2   :  { %1822 = vsyncpa [#allocation5], 1 }

</bundles_post_ra>
